<compile_context>
chip_gen: v6e
topology: v6e:2x2x1
jax: 0.10.0
libtpu: 0.0.40
codegen_flags: <defaults>
</compile_context>

<pallas_src>
import functools

import jax
import jax.numpy as jnp
from jax.experimental import pallas as pl
from jax.experimental.pallas import tpu as pltpu


MXU_DTYPE = jnp.bfloat16  # matmul operand dtype (fp32 accumulation everywhere)


def _fit(dim, target):
    """Pick a tile size: full dim if small / non-divisible, otherwise the target tile."""
    if dim <= target:
        return dim
    if dim % target == 0:
        return target
    return dim


# ----------------------------- fused linear (tiled) -----------------------------

def _linear_kernel(x_ref, w_ref, b_ref, o_ref, acc_ref, *, act):
    @pl.when(pl.program_id(2) == 0)
    def _():
        acc_ref[...] = jnp.zeros_like(acc_ref)

    acc_ref[...] += jnp.dot(x_ref[...].astype(MXU_DTYPE), w_ref[...],
                            preferred_element_type=jnp.float32)

    @pl.when(pl.program_id(2) == pl.num_programs(2) - 1)
    def _():
        y = acc_ref[...] + b_ref[...]
        if act == "gelu":
            # BERT intermediate activation (tanh-approximate GELU).
            y = 0.5 * y * (1.0 + jnp.tanh(0.7978845608028654 * (y + 0.044715 * y * y * y)))
        elif act == "tanh":
            y = jnp.tanh(y)
        o_ref[...] = y.astype(o_ref.dtype)


def pallas_linear(x, w, b, act="none", tm=256, tn=256, tk=512):
    """y = act(x @ w + b).  x:(M,K) fp32, w:(K,N) bf16, b:(1,N) fp32 -> (M,N) fp32."""
    M, K = x.shape
    N = w.shape[1]
    tm, tn, tk = _fit(M, tm), _fit(N, tn), _fit(K, tk)
    grid = (M // tm, N // tn, K // tk)
    return pl.pallas_call(
        functools.partial(_linear_kernel, act=act),
        out_shape=jax.ShapeDtypeStruct((M, N), jnp.float32),
        grid_spec=pltpu.PrefetchScalarGridSpec(
            num_scalar_prefetch=0,
            grid=grid,
            in_specs=[
                pl.BlockSpec((tm, tk), lambda i, j, k: (i, k)),
                pl.BlockSpec((tk, tn), lambda i, j, k: (k, j)),
                pl.BlockSpec((1, tn), lambda i, j, k: (0, j)),
            ],
            out_specs=pl.BlockSpec((tm, tn), lambda i, j, k: (i, j)),
            scratch_shapes=[pltpu.VMEM((tm, tn), jnp.float32)],
        ),
        compiler_params=pltpu.CompilerParams(
            dimension_semantics=("parallel", "parallel", "arbitrary")),
    )(x, w, b)


# ---------------- fused projection + residual-add + LayerNorm (tiled) ----------------

def _proj_res_ln_kernel(x_ref, w_ref, b_ref, res_ref, g_ref, beta_ref, o_ref, acc_ref, *, eps):
    @pl.when(pl.program_id(1) == 0)
    def _():
        acc_ref[...] = jnp.zeros_like(acc_ref)

    acc_ref[...] += jnp.dot(x_ref[...].astype(MXU_DTYPE), w_ref[...],
                            preferred_element_type=jnp.float32)

    @pl.when(pl.program_id(1) == pl.num_programs(1) - 1)
    def _():
        y = acc_ref[...] + b_ref[...] + res_ref[...]
        mu = jnp.mean(y, axis=-1, keepdims=True)
        yc = y - mu
        var = jnp.mean(yc * yc, axis=-1, keepdims=True)
        inv = jax.lax.rsqrt(var + eps)
        o_ref[...] = (yc * inv * g_ref[...] + beta_ref[...]).astype(o_ref.dtype)


def pallas_proj_residual_ln(x, w, b, residual, gamma, beta, eps=1e-12, tm=256, tk=512):
    """LayerNorm(residual + x @ w + b).  x:(M,K), w:(K,N) bf16, residual:(M,N)."""
    M, K = x.shape
    N = w.shape[1]
    tm, tk = _fit(M, tm), _fit(K, tk)
    grid = (M // tm, K // tk)
    return pl.pallas_call(
        functools.partial(_proj_res_ln_kernel, eps=eps),
        out_shape=jax.ShapeDtypeStruct((M, N), jnp.float32),
        grid_spec=pltpu.PrefetchScalarGridSpec(
            num_scalar_prefetch=0,
            grid=grid,
            in_specs=[
                pl.BlockSpec((tm, tk), lambda i, k: (i, k)),
                pl.BlockSpec((tk, N), lambda i, k: (k, 0)),
                pl.BlockSpec((1, N), lambda i, k: (0, 0)),
                pl.BlockSpec((tm, N), lambda i, k: (i, 0)),
                pl.BlockSpec((1, N), lambda i, k: (0, 0)),
                pl.BlockSpec((1, N), lambda i, k: (0, 0)),
            ],
            out_specs=pl.BlockSpec((tm, N), lambda i, k: (i, 0)),
            scratch_shapes=[pltpu.VMEM((tm, N), jnp.float32)],
        ),
        compiler_params=pltpu.CompilerParams(
            dimension_semantics=("parallel", "arbitrary")),
    )(x, w, b, residual, gamma, beta)


# ------------------------------- LayerNorm (row-tiled) -------------------------------

def _layernorm_kernel(x_ref, g_ref, b_ref, o_ref, *, eps):
    x = x_ref[...]
    mu = jnp.mean(x, axis=-1, keepdims=True)
    xc = x - mu
    var = jnp.mean(xc * xc, axis=-1, keepdims=True)
    inv = jax.lax.rsqrt(var + eps)
    o_ref[...] = (xc * inv * g_ref[...] + b_ref[...]).astype(o_ref.dtype)


def pallas_layernorm(x, gamma, beta, eps=1e-12, tm=256):
    M, H = x.shape
    tm = _fit(M, tm)
    return pl.pallas_call(
        functools.partial(_layernorm_kernel, eps=eps),
        out_shape=jax.ShapeDtypeStruct((M, H), jnp.float32),
        grid=(M // tm,),
        in_specs=[
            pl.BlockSpec((tm, H), lambda i: (i, 0)),
            pl.BlockSpec((1, H), lambda i: (0, 0)),
            pl.BlockSpec((1, H), lambda i: (0, 0)),
        ],
        out_specs=pl.BlockSpec((tm, H), lambda i: (i, 0)),
        compiler_params=pltpu.CompilerParams(dimension_semantics=("parallel",)),
    )(x, gamma, beta)


# --------------------------- attention (all heads per batch) ---------------------------

def _attention_kernel(qkv_ref, bias_ref, o_ref, *, num_heads, head_dim, scale):
    H = num_heads * head_dim
    qkv = qkv_ref[...]                 # (S, 3H) fp32
    bias = bias_ref[0]                 # (1, S)  additive mask, fp32
    ctx_heads = []
    # Static (unrolled) loop over heads: keeps everything as plain 2-D MXU dots and
    # avoids any HBM-level head transposes.  For production S, replace with a
    # flash-style q-tile x kv-tile grid.
    for h in range(num_heads):
        lo = h * head_dim
        q = qkv[:, lo:lo + head_dim].astype(MXU_DTYPE)                    # (S, dh)
        k = qkv[:, H + lo:H + lo + head_dim].astype(MXU_DTYPE)            # (S, dh)
        v = qkv[:, 2 * H + lo:2 * H + lo + head_dim].astype(MXU_DTYPE)    # (S, dh)
        s = jnp.dot(q, k.T, preferred_element_type=jnp.float32) * scale + bias  # (S, S)
        s = s - jnp.max(s, axis=-1, keepdims=True)
        p = jnp.exp(s)
        p = p * pl.reciprocal(jnp.sum(p, axis=-1, keepdims=True), approx=True)
        ctx_heads.append(jnp.dot(p.astype(MXU_DTYPE), v,
                                 preferred_element_type=jnp.float32))     # (S, dh)
    o_ref[...] = jnp.concatenate(ctx_heads, axis=-1).astype(o_ref.dtype)  # one (S, H) store


def pallas_attention(qkv, att_bias, *, batch, seq, num_heads, head_dim, scale):
    """qkv:(B*S, 3H) from the fused QKV projection, att_bias:(B,1,S) additive mask.
    Returns context (B*S, H) with heads already merged (no transposes needed)."""
    M, three_h = qkv.shape
    H = num_heads * head_dim
    return pl.pallas_call(
        functools.partial(_attention_kernel, num_heads=num_heads,
                          head_dim=head_dim, scale=scale),
        out_shape=jax.ShapeDtypeStruct((M, H), jnp.float32),
        grid=(batch,),
        in_specs=[
            pl.BlockSpec((seq, three_h), lambda b: (b, 0)),
            pl.BlockSpec((1, 1, seq), lambda b: (b, 0, 0)),
        ],
        out_specs=pl.BlockSpec((seq, H), lambda b: (b, 0)),
        compiler_params=pltpu.CompilerParams(dimension_semantics=("parallel",)),
    )(qkv, att_bias)


# ------------------------- pooler + classifier head (fused) -------------------------

def _pooler_head_kernel(cls_ref, pw_ref, pb_ref, ow_ref, ob_ref, o_ref):
    pooled = jnp.tanh(
        jnp.dot(cls_ref[...].astype(MXU_DTYPE), pw_ref[...],
                preferred_element_type=jnp.float32) + pb_ref[...])
    # bert_drop: nn.Dropout in eval mode is identity.
    logits = jnp.dot(pooled.astype(MXU_DTYPE), ow_ref[...],
                     preferred_element_type=jnp.float32) + ob_ref[...]
    o_ref[...] = logits.astype(o_ref.dtype)


def pallas_pooler_head(cls, pool_w, pool_b, out_w, out_b):
    """logits = (tanh(cls @ pool_w + pool_b)) @ out_w + out_b, in one tiny kernel."""
    B, H = cls.shape
    C = out_w.shape[1]
    return pl.pallas_call(
        _pooler_head_kernel,
        out_shape=jax.ShapeDtypeStruct((B, C), jnp.float32),
        grid=(1,),
        in_specs=[
            pl.BlockSpec((B, H), lambda i: (0, 0)),
            pl.BlockSpec((H, H), lambda i: (0, 0)),
            pl.BlockSpec((1, H), lambda i: (0, 0)),
            pl.BlockSpec((H, C), lambda i: (0, 0)),
            pl.BlockSpec((1, C), lambda i: (0, 0)),
        ],
        out_specs=pl.BlockSpec((B, C), lambda i: (0, 0)),
    )(cls, pool_w, pool_b, out_w, out_b)


# ------------------------------------ model glue ------------------------------------

class TinyBertConfig:
    vocab_size = 64
    type_vocab_size = 2
    max_position = 16
    hidden = 32
    num_heads = 4
    num_layers = 2
    intermediate = 64
    num_classes = 3
    seq = 8
    batch = 2


def init_params(cfg, key):
    """Deterministic synthetic BERT weights (BERT-style N(0, 0.02) init).
    Matmul weights are stored bf16 (MXU operands); LN params / biases stay fp32."""
    def nrm(k, shape):
        return (0.02 * jax.random.normal(k, shape)).astype(jnp.float32)

    keys = iter(jax.random.split(key, 256))
    H, I = cfg.hidden, cfg.intermediate
    p = {
        "word_emb": nrm(next(keys), (cfg.vocab_size, H)),
        "pos_emb": nrm(next(keys), (cfg.max_position, H)),
        "type_emb": nrm(next(keys), (cfg.type_vocab_size, H)),
        "emb_ln_g": jnp.ones((1, H), jnp.float32),
        "emb_ln_b": jnp.zeros((1, H), jnp.float32),
        "layers": [],
        "pool_w": nrm(next(keys), (H, H)).astype(MXU_DTYPE),
        "pool_b": jnp.zeros((1, H), jnp.float32),
        "out_w": nrm(next(keys), (H, cfg.num_classes)).astype(MXU_DTYPE),
        "out_b": jnp.zeros((1, cfg.num_classes), jnp.float32),
    }
    for _ in range(cfg.num_layers):
        wq, wk, wv = (nrm(next(keys), (H, H)) for _ in range(3))
        layer = {
            # fused QKV projection weight: (H, 3H), columns ordered [Q | K | V]
            "wqkv": jnp.concatenate([wq, wk, wv], axis=1).astype(MXU_DTYPE),
            "bqkv": jnp.zeros((1, 3 * H), jnp.float32),
            "wo": nrm(next(keys), (H, H)).astype(MXU_DTYPE),
            "bo": jnp.zeros((1, H), jnp.float32),
            "ln1_g": jnp.ones((1, H), jnp.float32), "ln1_b": jnp.zeros((1, H), jnp.float32),
            "w1": nrm(next(keys), (H, I)).astype(MXU_DTYPE),
            "b1": jnp.zeros((1, I), jnp.float32),
            "w2": nrm(next(keys), (I, H)).astype(MXU_DTYPE),
            "b2": jnp.zeros((1, H), jnp.float32),
            "ln2_g": jnp.ones((1, H), jnp.float32), "ln2_b": jnp.zeros((1, H), jnp.float32),
        }
        p["layers"].append(layer)
    return p


def bert_base_uncased_forward(params, cfg, ids, mask, token_type_ids):
    """Equivalent of BERTBaseUncased.forward(ids, mask, token_type_ids) in eval mode."""
    B, S = ids.shape
    H, nH = cfg.hidden, cfg.num_heads
    dh = H // nH
    M = B * S

    # --- embeddings (gathers = glue) + LayerNorm (Pallas, row-tiled) ---
    pos_ids = jnp.arange(S, dtype=jnp.int32)
    emb = (params["word_emb"][ids]
           + params["pos_emb"][pos_ids][None, :, :]
           + params["type_emb"][token_type_ids])                       # (B,S,H)
    x = pallas_layernorm(emb.reshape(M, H),
                         params["emb_ln_g"], params["emb_ln_b"])       # (M,H)

    # HF-style additive attention mask: (1 - mask) * -10000, per key position
    att_bias = ((1.0 - mask.astype(jnp.float32)) * -10000.0).reshape(B, 1, S)
    scale = 1.0 / (dh ** 0.5)

    # --- transformer encoder: 5 pallas_calls per layer ---
    for L in params["layers"]:
        qkv = pallas_linear(x, L["wqkv"], L["bqkv"])                   # (M, 3H) fused Q|K|V
        ctx = pallas_attention(qkv, att_bias, batch=B, seq=S,
                               num_heads=nH, head_dim=dh, scale=scale) # (M, H)
        # attention out-proj + residual + LayerNorm fused
        x = pallas_proj_residual_ln(ctx, L["wo"], L["bo"], x, L["ln1_g"], L["ln1_b"])
        ffn = pallas_linear(x, L["w1"], L["b1"], act="gelu")           # (M, I)
        # FFN down-proj + residual + LayerNorm fused
        x = pallas_proj_residual_ln(ffn, L["w2"], L["b2"], x, L["ln2_g"], L["ln2_b"])

    # --- pooler (tanh) + dropout(eval=identity) + classifier, fused in one kernel ---
    # TODO(synk): training-mode dropout (pltpu.prng_*) not implemented; forward uses eval semantics.
    cls = x.reshape(B, S, H)[:, 0, :]                                  # (B, H)
    logits = pallas_pooler_head(cls, params["pool_w"], params["pool_b"],
                                params["out_w"], params["out_b"])      # (B, num_classes)
    return logits


# --------------------------------------- main ---------------------------------------

if __name__ == "__main__":
    cfg = TinyBertConfig()
    key = jax.random.PRNGKey(0)
    k_param, k_ids, k_type = jax.random.split(key, 3)

    params = init_params(cfg, k_param)

    ids = jax.random.randint(k_ids, (cfg.batch, cfg.seq), 0, cfg.vocab_size, dtype=jnp.int32)
    token_type_ids = jax.random.randint(k_type, (cfg.batch, cfg.seq), 0,
                                        cfg.type_vocab_size, dtype=jnp.int32)
    # attention mask: batch 0 fully attended, batch 1 has 2 padding positions
    mask = jnp.array([[1] * cfg.seq,
                      [1] * (cfg.seq - 2) + [0, 0]], dtype=jnp.int32)

    @jax.jit
    def fwd(p, i, m, t):
        return bert_base_uncased_forward(p, cfg, i, m, t)

    logits = fwd(params, ids, mask, token_type_ids)
    logits = jax.block_until_ready(logits)

    assert logits.shape == (cfg.batch, cfg.num_classes)
    assert logits.dtype == jnp.float32
    assert bool(jnp.all(jnp.isfinite(logits)))
    print("KERNEL_OK")
</pallas_src>

<mosaic_0001>
module attributes {stable_mosaic.version = 11 : i64} {
  func.func @_layernorm_kernel(%arg0: i32, %arg1: memref<16x32xf32, #tpu.memory_space<vmem>>, %arg2: memref<1x32xf32, #tpu.memory_space<vmem>>, %arg3: memref<1x32xf32, #tpu.memory_space<vmem>>, %arg4: memref<16x32xf32, #tpu.memory_space<vmem>>) attributes {dimension_semantics = [#tpu.dimension_semantics<parallel>], iteration_bounds = array<i64: 1>, scalar_prefetch = 0 : i64, scratch_operands = 0 : i64, tpu.core_type = #tpu.core_type<tc>, window_params = [{transform_indices = @transform_0, window_bounds = array<i64: 16, 32>}, {pipeline_mode = #tpu.pipeline_mode<synchronous>, transform_indices = @transform_1, window_bounds = array<i64: 1, 32>}, {pipeline_mode = #tpu.pipeline_mode<synchronous>, transform_indices = @transform_2, window_bounds = array<i64: 1, 32>}, {transform_indices = @transform_3, window_bounds = array<i64: 16, 32>}]} {
    %c0 = arith.constant 0 : index
    %c0_0 = arith.constant 0 : index
    %0 = vector.load %arg1[%c0, %c0_0] : memref<16x32xf32, #tpu.memory_space<vmem>>, vector<16x32xf32>
    %cst = arith.constant dense<0.000000e+00> : vector<16xf32>
    %1 = vector.multi_reduction <add>, %0, %cst [1] : vector<16x32xf32> to vector<16xf32>
    %2 = vector.shape_cast %1 : vector<16xf32> to vector<16x1xf32>
    %cst_1 = arith.constant 3.200000e+01 : f32
    %3 = vector.broadcast %cst_1 : f32 to vector<16x1xf32>
    %4 = arith.divf %2, %3 : vector<16x1xf32>
    %5 = vector.broadcast %4 : vector<16x1xf32> to vector<16x32xf32>
    %6 = arith.subf %0, %5 : vector<16x32xf32>
    %7 = arith.mulf %6, %6 : vector<16x32xf32>
    %cst_2 = arith.constant dense<0.000000e+00> : vector<16xf32>
    %8 = vector.multi_reduction <add>, %7, %cst_2 [1] : vector<16x32xf32> to vector<16xf32>
    %9 = vector.shape_cast %8 : vector<16xf32> to vector<16x1xf32>
    %cst_3 = arith.constant 3.200000e+01 : f32
    %10 = vector.broadcast %cst_3 : f32 to vector<16x1xf32>
    %11 = arith.divf %9, %10 : vector<16x1xf32>
    %cst_4 = arith.constant 9.99999996E-13 : f32
    %12 = vector.broadcast %cst_4 : f32 to vector<16x1xf32>
    %13 = arith.addf %11, %12 : vector<16x1xf32>
    %14 = math.rsqrt %13 : vector<16x1xf32>
    %15 = vector.broadcast %14 : vector<16x1xf32> to vector<16x32xf32>
    %16 = arith.mulf %6, %15 : vector<16x32xf32>
    %c0_5 = arith.constant 0 : index
    %c0_6 = arith.constant 0 : index
    %17 = vector.load %arg2[%c0_5, %c0_6] : memref<1x32xf32, #tpu.memory_space<vmem>>, vector<1x32xf32>
    %18 = vector.broadcast %17 : vector<1x32xf32> to vector<16x32xf32>
    %19 = arith.mulf %16, %18 : vector<16x32xf32>
    %c0_7 = arith.constant 0 : index
    %c0_8 = arith.constant 0 : index
    %20 = vector.load %arg3[%c0_7, %c0_8] : memref<1x32xf32, #tpu.memory_space<vmem>>, vector<1x32xf32>
    %21 = vector.broadcast %20 : vector<1x32xf32> to vector<16x32xf32>
    %22 = arith.addf %19, %21 : vector<16x32xf32>
    %c0_9 = arith.constant 0 : index
    %c0_10 = arith.constant 0 : index
    %23 = vector.load %arg4[%c0_9, %c0_10] : memref<16x32xf32, #tpu.memory_space<vmem>>, vector<16x32xf32>
    tpu.vector_store %arg4[%c0_9, %c0_10], %22 {strides = array<i32>} : memref<16x32xf32, #tpu.memory_space<vmem>>, vector<16x32xf32>,
    return
  }
  func.func @transform_0(%arg0: i32) -> (i32, i32) {
    %c0_i32 = arith.constant 0 : i32
    %c0_i32_0 = arith.constant 0 : i32
    return %arg0, %c0_i32 : i32, i32
  }
  func.func @transform_1(%arg0: i32) -> (i32, i32) {
    %c0_i32 = arith.constant 0 : i32
    %c0_i32_0 = arith.constant 0 : i32
    %c0_i32_1 = arith.constant 0 : i32
    return %c0_i32, %c0_i32_0 : i32, i32
  }
  func.func @transform_2(%arg0: i32) -> (i32, i32) {
    %c0_i32 = arith.constant 0 : i32
    %c0_i32_0 = arith.constant 0 : i32
    %c0_i32_1 = arith.constant 0 : i32
    return %c0_i32, %c0_i32_0 : i32, i32
  }
  func.func @transform_3(%arg0: i32) -> (i32, i32) {
    %c0_i32 = arith.constant 0 : i32
    %c0_i32_0 = arith.constant 0 : i32
    return %arg0, %c0_i32 : i32, i32
  }
}

module attributes {stable_mosaic.version = 11 : i64} {
  func.func @_linear_kernel(%arg0: i32, %arg1: i32, %arg2: i32, %arg3: memref<16x32xf32, #tpu.memory_space<vmem>>, %arg4: memref<32x96xbf16, #tpu.memory_space<vmem>>, %arg5: memref<1x96xf32, #tpu.memory_space<vmem>>, %arg6: memref<16x96xf32, #tpu.memory_space<vmem>>, %arg7: memref<16x96xf32, #tpu.memory_space<vmem>>) attributes {dimension_semantics = [#tpu.dimension_semantics<parallel>, #tpu.dimension_semantics<parallel>, #tpu.dimension_semantics<arbitrary>], iteration_bounds = array<i64: 1, 1, 1>, scalar_prefetch = 0 : i64, scratch_operands = 1 : i64, tpu.core_type = #tpu.core_type<tc>, window_params = [{transform_indices = @transform_0, window_bounds = array<i64: 16, 32>}, {transform_indices = @transform_1, window_bounds = array<i64: 32, 96>}, {transform_indices = @transform_2, window_bounds = array<i64: 1, 96>}, {transform_indices = @transform_3, window_bounds = array<i64: 16, 96>}]} {
    %c0_i32 = arith.constant 0 : i32
    %0 = arith.cmpi eq, %arg2, %c0_i32 : i32
    %1 = arith.extui %0 : i1 to i32
    %c0_i32_0 = arith.constant 0 : i32
    %2 = arith.cmpi ne, %1, %c0_i32_0 : i32
    scf.if %2 {
      %cst_10 = arith.constant 0.000000e+00 : f32
      %13 = vector.broadcast %cst_10 : f32 to vector<16x96xf32>
      %c0_11 = arith.constant 0 : index
      %c0_12 = arith.constant 0 : index
      %14 = vector.load %arg7[%c0_11, %c0_12] : memref<16x96xf32, #tpu.memory_space<vmem>>, vector<16x96xf32>
      tpu.vector_store %arg7[%c0_11, %c0_12], %13 {strides = array<i32>} : memref<16x96xf32, #tpu.memory_space<vmem>>, vector<16x96xf32>,
    } else {
    }
    %c0 = arith.constant 0 : index
    %c0_1 = arith.constant 0 : index
    %3 = vector.load %arg7[%c0, %c0_1] : memref<16x96xf32, #tpu.memory_space<vmem>>, vector<16x96xf32>
    %c0_2 = arith.constant 0 : index
    %c0_3 = arith.constant 0 : index
    %4 = vector.load %arg3[%c0_2, %c0_3] : memref<16x32xf32, #tpu.memory_space<vmem>>, vector<16x32xf32>
    %5 = arith.truncf %4 : vector<16x32xf32> to vector<16x32xbf16>
    %c0_4 = arith.constant 0 : index
    %c0_5 = arith.constant 0 : index
    %6 = vector.load %arg4[%c0_4, %c0_5] : memref<32x96xbf16, #tpu.memory_space<vmem>>, vector<32x96xbf16>
    %cst = arith.constant dense<0.000000e+00> : vector<16x96xf32>
    %7 = tpu.matmul %5, %6, %cst {dimension_numbers = #tpu.dot_dimension_numbers<[1], [0], [0], [1], [0, 0, 1, 1], [], []>} : vector<16x32xbf16>, vector<32x96xbf16>, vector<16x96xf32> -> vector<16x96xf32>
    %8 = arith.addf %3, %7 : vector<16x96xf32>
    %c0_6 = arith.constant 0 : index
    %c0_7 = arith.constant 0 : index
    %9 = vector.load %arg7[%c0_6, %c0_7] : memref<16x96xf32, #tpu.memory_space<vmem>>, vector<16x96xf32>
    tpu.vector_store %arg7[%c0_6, %c0_7], %8 {strides = array<i32>} : memref<16x96xf32, #tpu.memory_space<vmem>>, vector<16x96xf32>,
    %c0_i32_8 = arith.constant 0 : i32
    %10 = arith.cmpi eq, %arg2, %c0_i32_8 : i32
    %11 = arith.extui %10 : i1 to i32
    %c0_i32_9 = arith.constant 0 : i32
    %12 = arith.cmpi ne, %11, %c0_i32_9 : i32
    scf.if %12 {
      %c0_10 = arith.constant 0 : index
      %c0_11 = arith.constant 0 : index
      %13 = vector.load %arg7[%c0_10, %c0_11] : memref<16x96xf32, #tpu.memory_space<vmem>>, vector<16x96xf32>
      %c0_12 = arith.constant 0 : index
      %c0_13 = arith.constant 0 : index
      %14 = vector.load %arg5[%c0_12, %c0_13] : memref<1x96xf32, #tpu.memory_space<vmem>>, vector<1x96xf32>
      %15 = vector.broadcast %14 : vector<1x96xf32> to vector<16x96xf32>
      %16 = arith.addf %13, %15 : vector<16x96xf32>
      %c0_14 = arith.constant 0 : index
      %c0_15 = arith.constant 0 : index
      %17 = vector.load %arg6[%c0_14, %c0_15] : memref<16x96xf32, #tpu.memory_space<vmem>>, vector<16x96xf32>
      tpu.vector_store %arg6[%c0_14, %c0_15], %16 {strides = array<i32>} : memref<16x96xf32, #tpu.memory_space<vmem>>, vector<16x96xf32>,
    } else {
    }
    return
  }
  func.func @transform_0(%arg0: i32, %arg1: i32, %arg2: i32) -> (i32, i32) {
    %c0_i32 = arith.constant 0 : i32
    return %arg0, %arg2 : i32, i32
  }
  func.func @transform_1(%arg0: i32, %arg1: i32, %arg2: i32) -> (i32, i32) {
    %c0_i32 = arith.constant 0 : i32
    return %arg2, %arg1 : i32, i32
  }
  func.func @transform_2(%arg0: i32, %arg1: i32, %arg2: i32) -> (i32, i32) {
    %c0_i32 = arith.constant 0 : i32
    %c0_i32_0 = arith.constant 0 : i32
    return %c0_i32, %arg1 : i32, i32
  }
  func.func @transform_3(%arg0: i32, %arg1: i32, %arg2: i32) -> (i32, i32) {
    %c0_i32 = arith.constant 0 : i32
    return %arg0, %arg1 : i32, i32
  }
}

module attributes {stable_mosaic.version = 11 : i64} {
  func.func @_proj_res_ln_kernel(%arg0: i32, %arg1: i32, %arg2: memref<16x32xf32, #tpu.memory_space<vmem>>, %arg3: memref<32x32xbf16, #tpu.memory_space<vmem>>, %arg4: memref<1x32xf32, #tpu.memory_space<vmem>>, %arg5: memref<16x32xf32, #tpu.memory_space<vmem>>, %arg6: memref<1x32xf32, #tpu.memory_space<vmem>>, %arg7: memref<1x32xf32, #tpu.memory_space<vmem>>, %arg8: memref<16x32xf32, #tpu.memory_space<vmem>>, %arg9: memref<16x32xf32, #tpu.memory_space<vmem>>) attributes {dimension_semantics = [#tpu.dimension_semantics<parallel>, #tpu.dimension_semantics<arbitrary>], iteration_bounds = array<i64: 1, 1>, scalar_prefetch = 0 : i64, scratch_operands = 1 : i64, tpu.core_type = #tpu.core_type<tc>, window_params = [{transform_indices = @transform_0, window_bounds = array<i64: 16, 32>}, {transform_indices = @transform_1, window_bounds = array<i64: 32, 32>}, {pipeline_mode = #tpu.pipeline_mode<synchronous>, transform_indices = @transform_2, window_bounds = array<i64: 1, 32>}, {transform_indices = @transform_3, window_bounds = array<i64: 16, 32>}, {pipeline_mode = #tpu.pipeline_mode<synchronous>, transform_indices = @transform_4, window_bounds = array<i64: 1, 32>}, {pipeline_mode = #tpu.pipeline_mode<synchronous>, transform_indices = @transform_5, window_bounds = array<i64: 1, 32>}, {transform_indices = @transform_6, window_bounds = array<i64: 16, 32>}]} {
    %c0_i32 = arith.constant 0 : i32
    %0 = arith.cmpi eq, %arg1, %c0_i32 : i32
    %1 = arith.extui %0 : i1 to i32
    %c0_i32_0 = arith.constant 0 : i32
    %2 = arith.cmpi ne, %1, %c0_i32_0 : i32
    scf.if %2 {
      %cst_10 = arith.constant 0.000000e+00 : f32
      %13 = vector.broadcast %cst_10 : f32 to vector<16x32xf32>
      %c0_11 = arith.constant 0 : index
      %c0_12 = arith.constant 0 : index
      %14 = vector.load %arg9[%c0_11, %c0_12] : memref<16x32xf32, #tpu.memory_space<vmem>>, vector<16x32xf32>
      tpu.vector_store %arg9[%c0_11, %c0_12], %13 {strides = array<i32>} : memref<16x32xf32, #tpu.memory_space<vmem>>, vector<16x32xf32>,
    } else {
    }
    %c0 = arith.constant 0 : index
    %c0_1 = arith.constant 0 : index
    %3 = vector.load %arg9[%c0, %c0_1] : memref<16x32xf32, #tpu.memory_space<vmem>>, vector<16x32xf32>
    %c0_2 = arith.constant 0 : index
    %c0_3 = arith.constant 0 : index
    %4 = vector.load %arg2[%c0_2, %c0_3] : memref<16x32xf32, #tpu.memory_space<vmem>>, vector<16x32xf32>
    %5 = arith.truncf %4 : vector<16x32xf32> to vector<16x32xbf16>
    %c0_4 = arith.constant 0 : index
    %c0_5 = arith.constant 0 : index
    %6 = vector.load %arg3[%c0_4, %c0_5] : memref<32x32xbf16, #tpu.memory_space<vmem>>, vector<32x32xbf16>
    %cst = arith.constant dense<0.000000e+00> : vector<16x32xf32>
    %7 = tpu.matmul %5, %6, %cst {dimension_numbers = #tpu.dot_dimension_numbers<[1], [0], [0], [1], [0, 0, 1, 1], [], []>} : vector<16x32xbf16>, vector<32x32xbf16>, vector<16x32xf32> -> vector<16x32xf32>
    %8 = arith.addf %3, %7 : vector<16x32xf32>
    %c0_6 = arith.constant 0 : index
    %c0_7 = arith.constant 0 : index
    %9 = vector.load %arg9[%c0_6, %c0_7] : memref<16x32xf32, #tpu.memory_space<vmem>>, vector<16x32xf32>
    tpu.vector_store %arg9[%c0_6, %c0_7], %8 {strides = array<i32>} : memref<16x32xf32, #tpu.memory_space<vmem>>, vector<16x32xf32>,
    %c0_i32_8 = arith.constant 0 : i32
    %10 = arith.cmpi eq, %arg1, %c0_i32_8 : i32
    %11 = arith.extui %10 : i1 to i32
    %c0_i32_9 = arith.constant 0 : i32
    %12 = arith.cmpi ne, %11, %c0_i32_9 : i32
    scf.if %12 {
      %c0_10 = arith.constant 0 : index
      %c0_11 = arith.constant 0 : index
      %13 = vector.load %arg9[%c0_10, %c0_11] : memref<16x32xf32, #tpu.memory_space<vmem>>, vector<16x32xf32>
      %c0_12 = arith.constant 0 : index
      %c0_13 = arith.constant 0 : index
      %14 = vector.load %arg4[%c0_12, %c0_13] : memref<1x32xf32, #tpu.memory_space<vmem>>, vector<1x32xf32>
      %15 = vector.broadcast %14 : vector<1x32xf32> to vector<16x32xf32>
      %16 = arith.addf %13, %15 : vector<16x32xf32>
      %c0_14 = arith.constant 0 : index
      %c0_15 = arith.constant 0 : index
      %17 = vector.load %arg5[%c0_14, %c0_15] : memref<16x32xf32, #tpu.memory_space<vmem>>, vector<16x32xf32>
      %18 = arith.addf %16, %17 : vector<16x32xf32>
      %cst_16 = arith.constant dense<0.000000e+00> : vector<16xf32>
      %19 = vector.multi_reduction <add>, %18, %cst_16 [1] : vector<16x32xf32> to vector<16xf32>
      %20 = vector.shape_cast %19 : vector<16xf32> to vector<16x1xf32>
      %cst_17 = arith.constant 3.200000e+01 : f32
      %21 = vector.broadcast %cst_17 : f32 to vector<16x1xf32>
      %22 = arith.divf %20, %21 : vector<16x1xf32>
      %23 = vector.broadcast %22 : vector<16x1xf32> to vector<16x32xf32>
      %24 = arith.subf %18, %23 : vector<16x32xf32>
      %25 = arith.mulf %24, %24 : vector<16x32xf32>
      %cst_18 = arith.constant dense<0.000000e+00> : vector<16xf32>
      %26 = vector.multi_reduction <add>, %25, %cst_18 [1] : vector<16x32xf32> to vector<16xf32>
      %27 = vector.shape_cast %26 : vector<16xf32> to vector<16x1xf32>
      %cst_19 = arith.constant 3.200000e+01 : f32
      %28 = vector.broadcast %cst_19 : f32 to vector<16x1xf32>
      %29 = arith.divf %27, %28 : vector<16x1xf32>
      %cst_20 = arith.constant 9.99999996E-13 : f32
      %30 = vector.broadcast %cst_20 : f32 to vector<16x1xf32>
      %31 = arith.addf %29, %30 : vector<16x1xf32>
      %32 = math.rsqrt %31 : vector<16x1xf32>
      %33 = vector.broadcast %32 : vector<16x1xf32> to vector<16x32xf32>
      %34 = arith.mulf %24, %33 : vector<16x32xf32>
      %c0_21 = arith.constant 0 : index
      %c0_22 = arith.constant 0 : index
      %35 = vector.load %arg6[%c0_21, %c0_22] : memref<1x32xf32, #tpu.memory_space<vmem>>, vector<1x32xf32>
      %36 = vector.broadcast %35 : vector<1x32xf32> to vector<16x32xf32>
      %37 = arith.mulf %34, %36 : vector<16x32xf32>
      %c0_23 = arith.constant 0 : index
      %c0_24 = arith.constant 0 : index
      %38 = vector.load %arg7[%c0_23, %c0_24] : memref<1x32xf32, #tpu.memory_space<vmem>>, vector<1x32xf32>
      %39 = vector.broadcast %38 : vector<1x32xf32> to vector<16x32xf32>
      %40 = arith.addf %37, %39 : vector<16x32xf32>
      %c0_25 = arith.constant 0 : index
      %c0_26 = arith.constant 0 : index
      %41 = vector.load %arg8[%c0_25, %c0_26] : memref<16x32xf32, #tpu.memory_space<vmem>>, vector<16x32xf32>
      tpu.vector_store %arg8[%c0_25, %c0_26], %40 {strides = array<i32>} : memref<16x32xf32, #tpu.memory_space<vmem>>, vector<16x32xf32>,
    } else {
    }
    return
  }
  func.func @transform_0(%arg0: i32, %arg1: i32) -> (i32, i32) {
    %c0_i32 = arith.constant 0 : i32
    return %arg0, %arg1 : i32, i32
  }
  func.func @transform_1(%arg0: i32, %arg1: i32) -> (i32, i32) {
    %c0_i32 = arith.constant 0 : i32
    %c0_i32_0 = arith.constant 0 : i32
    return %arg1, %c0_i32 : i32, i32
  }
  func.func @transform_2(%arg0: i32, %arg1: i32) -> (i32, i32) {
    %c0_i32 = arith.constant 0 : i32
    %c0_i32_0 = arith.constant 0 : i32
    %c0_i32_1 = arith.constant 0 : i32
    return %c0_i32, %c0_i32_0 : i32, i32
  }
  func.func @transform_3(%arg0: i32, %arg1: i32) -> (i32, i32) {
    %c0_i32 = arith.constant 0 : i32
    %c0_i32_0 = arith.constant 0 : i32
    return %arg0, %c0_i32 : i32, i32
  }
  func.func @transform_4(%arg0: i32, %arg1: i32) -> (i32, i32) {
    %c0_i32 = arith.constant 0 : i32
    %c0_i32_0 = arith.constant 0 : i32
    %c0_i32_1 = arith.constant 0 : i32
    return %c0_i32, %c0_i32_0 : i32, i32
  }
  func.func @transform_5(%arg0: i32, %arg1: i32) -> (i32, i32) {
    %c0_i32 = arith.constant 0 : i32
    %c0_i32_0 = arith.constant 0 : i32
    %c0_i32_1 = arith.constant 0 : i32
    return %c0_i32, %c0_i32_0 : i32, i32
  }
  func.func @transform_6(%arg0: i32, %arg1: i32) -> (i32, i32) {
    %c0_i32 = arith.constant 0 : i32
    %c0_i32_0 = arith.constant 0 : i32
    return %arg0, %c0_i32 : i32, i32
  }
}

module attributes {stable_mosaic.version = 11 : i64} {
  func.func @_attention_kernel(%arg0: i32, %arg1: memref<8x96xf32, #tpu.memory_space<vmem>>, %arg2: memref<1x1x8xf32, #tpu.memory_space<vmem>>, %arg3: memref<8x32xf32, #tpu.memory_space<vmem>>) attributes {dimension_semantics = [#tpu.dimension_semantics<parallel>], iteration_bounds = array<i64: 2>, scalar_prefetch = 0 : i64, scratch_operands = 0 : i64, tpu.core_type = #tpu.core_type<tc>, window_params = [{transform_indices = @transform_0, window_bounds = array<i64: 8, 96>}, {transform_indices = @transform_1, window_bounds = array<i64: 1, 1, 8>}, {transform_indices = @transform_2, window_bounds = array<i64: 8, 32>}]} {
    %c0 = arith.constant 0 : index
    %c0_0 = arith.constant 0 : index
    %0 = vector.load %arg1[%c0, %c0_0] : memref<8x96xf32, #tpu.memory_space<vmem>>, vector<8x96xf32>
    %c0_1 = arith.constant 0 : index
    %c0_2 = arith.constant 0 : index
    %c0_3 = arith.constant 0 : index
    %1 = vector.load %arg2[%c0_1, %c0_2, %c0_3] : memref<1x1x8xf32, #tpu.memory_space<vmem>>, vector<1x1x8xf32>
    %2 = vector.shape_cast %1 : vector<1x1x8xf32> to vector<1x8xf32>
    %3 = vector.extract_strided_slice %0 {offsets = [0, 0], sizes = [8, 8], strides = [1, 1]} : vector<8x96xf32> to vector<8x8xf32>
    %4 = arith.truncf %3 : vector<8x8xf32> to vector<8x8xbf16>
    %5 = vector.extract_strided_slice %0 {offsets = [0, 32], sizes = [8, 8], strides = [1, 1]} : vector<8x96xf32> to vector<8x8xf32>
    %6 = arith.truncf %5 : vector<8x8xf32> to vector<8x8xbf16>
    %7 = vector.extract_strided_slice %0 {offsets = [0, 64], sizes = [8, 8], strides = [1, 1]} : vector<8x96xf32> to vector<8x8xf32>
    %8 = arith.truncf %7 : vector<8x8xf32> to vector<8x8xbf16>
    %9 = tpu.transpose %6, [1, 0] : vector<8x8xbf16> -> vector<8x8xbf16>
    %cst = arith.constant dense<0.000000e+00> : vector<8x8xf32>
    %10 = tpu.matmul %4, %9, %cst {dimension_numbers = #tpu.dot_dimension_numbers<[1], [0], [0], [1], [0, 0, 1, 1], [], []>} : vector<8x8xbf16>, vector<8x8xbf16>, vector<8x8xf32> -> vector<8x8xf32>
    %cst_4 = arith.constant 0.353553385 : f32
    %11 = vector.broadcast %cst_4 : f32 to vector<8x8xf32>
    %12 = arith.mulf %10, %11 : vector<8x8xf32>
    %13 = vector.broadcast %2 : vector<1x8xf32> to vector<8x8xf32>
    %14 = arith.addf %12, %13 : vector<8x8xf32>
    %cst_5 = arith.constant dense<0xFF800000> : vector<8xf32>
    %15 = vector.multi_reduction <maximumf>, %14, %cst_5 [1] : vector<8x8xf32> to vector<8xf32>
    %16 = vector.shape_cast %15 : vector<8xf32> to vector<8x1xf32>
    %17 = vector.broadcast %16 : vector<8x1xf32> to vector<8x8xf32>
    %18 = arith.subf %14, %17 : vector<8x8xf32>
    %19 = math.exp %18 : vector<8x8xf32>
    %cst_6 = arith.constant dense<0.000000e+00> : vector<8xf32>
    %20 = vector.multi_reduction <add>, %19, %cst_6 [1] : vector<8x8xf32> to vector<8xf32>
    %21 = vector.shape_cast %20 : vector<8xf32> to vector<8x1xf32>
    %22 = tpu.reciprocal %21 {approx = true} : vector<8x1xf32> -> vector<8x1xf32>
    %23 = vector.broadcast %22 : vector<8x1xf32> to vector<8x8xf32>
    %24 = arith.mulf %19, %23 : vector<8x8xf32>
    %25 = arith.truncf %24 : vector<8x8xf32> to vector<8x8xbf16>
    %cst_7 = arith.constant dense<0.000000e+00> : vector<8x8xf32>
    %26 = tpu.matmul %25, %8, %cst_7 {dimension_numbers = #tpu.dot_dimension_numbers<[1], [0], [0], [1], [0, 0, 1, 1], [], []>} : vector<8x8xbf16>, vector<8x8xbf16>, vector<8x8xf32> -> vector<8x8xf32>
    %27 = vector.extract_strided_slice %0 {offsets = [0, 8], sizes = [8, 8], strides = [1, 1]} : vector<8x96xf32> to vector<8x8xf32>
    %28 = arith.truncf %27 : vector<8x8xf32> to vector<8x8xbf16>
    %29 = vector.extract_strided_slice %0 {offsets = [0, 40], sizes = [8, 8], strides = [1, 1]} : vector<8x96xf32> to vector<8x8xf32>
    %30 = arith.truncf %29 : vector<8x8xf32> to vector<8x8xbf16>
    %31 = vector.extract_strided_slice %0 {offsets = [0, 72], sizes = [8, 8], strides = [1, 1]} : vector<8x96xf32> to vector<8x8xf32>
    %32 = arith.truncf %31 : vector<8x8xf32> to vector<8x8xbf16>
    %33 = tpu.transpose %30, [1, 0] : vector<8x8xbf16> -> vector<8x8xbf16>
    %cst_8 = arith.constant dense<0.000000e+00> : vector<8x8xf32>
    %34 = tpu.matmul %28, %33, %cst_8 {dimension_numbers = #tpu.dot_dimension_numbers<[1], [0], [0], [1], [0, 0, 1, 1], [], []>} : vector<8x8xbf16>, vector<8x8xbf16>, vector<8x8xf32> -> vector<8x8xf32>
    %cst_9 = arith.constant 0.353553385 : f32
    %35 = vector.broadcast %cst_9 : f32 to vector<8x8xf32>
    %36 = arith.mulf %34, %35 : vector<8x8xf32>
    %37 = vector.broadcast %2 : vector<1x8xf32> to vector<8x8xf32>
    %38 = arith.addf %36, %37 : vector<8x8xf32>
    %cst_10 = arith.constant dense<0xFF800000> : vector<8xf32>
    %39 = vector.multi_reduction <maximumf>, %38, %cst_10 [1] : vector<8x8xf32> to vector<8xf32>
    %40 = vector.shape_cast %39 : vector<8xf32> to vector<8x1xf32>
    %41 = vector.broadcast %40 : vector<8x1xf32> to vector<8x8xf32>
    %42 = arith.subf %38, %41 : vector<8x8xf32>
    %43 = math.exp %42 : vector<8x8xf32>
    %cst_11 = arith.constant dense<0.000000e+00> : vector<8xf32>
    %44 = vector.multi_reduction <add>, %43, %cst_11 [1] : vector<8x8xf32> to vector<8xf32>
    %45 = vector.shape_cast %44 : vector<8xf32> to vector<8x1xf32>
    %46 = tpu.reciprocal %45 {approx = true} : vector<8x1xf32> -> vector<8x1xf32>
    %47 = vector.broadcast %46 : vector<8x1xf32> to vector<8x8xf32>
    %48 = arith.mulf %43, %47 : vector<8x8xf32>
    %49 = arith.truncf %48 : vector<8x8xf32> to vector<8x8xbf16>
    %cst_12 = arith.constant dense<0.000000e+00> : vector<8x8xf32>
    %50 = tpu.matmul %49, %32, %cst_12 {dimension_numbers = #tpu.dot_dimension_numbers<[1], [0], [0], [1], [0, 0, 1, 1], [], []>} : vector<8x8xbf16>, vector<8x8xbf16>, vector<8x8xf32> -> vector<8x8xf32>
    %51 = vector.extract_strided_slice %0 {offsets = [0, 16], sizes = [8, 8], strides = [1, 1]} : vector<8x96xf32> to vector<8x8xf32>
    %52 = arith.truncf %51 : vector<8x8xf32> to vector<8x8xbf16>
    %53 = vector.extract_strided_slice %0 {offsets = [0, 48], sizes = [8, 8], strides = [1, 1]} : vector<8x96xf32> to vector<8x8xf32>
    %54 = arith.truncf %53 : vector<8x8xf32> to vector<8x8xbf16>
    %55 = vector.extract_strided_slice %0 {offsets = [0, 80], sizes = [8, 8], strides = [1, 1]} : vector<8x96xf32> to vector<8x8xf32>
    %56 = arith.truncf %55 : vector<8x8xf32> to vector<8x8xbf16>
    %57 = tpu.transpose %54, [1, 0] : vector<8x8xbf16> -> vector<8x8xbf16>
    %cst_13 = arith.constant dense<0.000000e+00> : vector<8x8xf32>
    %58 = tpu.matmul %52, %57, %cst_13 {dimension_numbers = #tpu.dot_dimension_numbers<[1], [0], [0], [1], [0, 0, 1, 1], [], []>} : vector<8x8xbf16>, vector<8x8xbf16>, vector<8x8xf32> -> vector<8x8xf32>
    %cst_14 = arith.constant 0.353553385 : f32
    %59 = vector.broadcast %cst_14 : f32 to vector<8x8xf32>
    %60 = arith.mulf %58, %59 : vector<8x8xf32>
    %61 = vector.broadcast %2 : vector<1x8xf32> to vector<8x8xf32>
    %62 = arith.addf %60, %61 : vector<8x8xf32>
    %cst_15 = arith.constant dense<0xFF800000> : vector<8xf32>
    %63 = vector.multi_reduction <maximumf>, %62, %cst_15 [1] : vector<8x8xf32> to vector<8xf32>
    %64 = vector.shape_cast %63 : vector<8xf32> to vector<8x1xf32>
    %65 = vector.broadcast %64 : vector<8x1xf32> to vector<8x8xf32>
    %66 = arith.subf %62, %65 : vector<8x8xf32>
    %67 = math.exp %66 : vector<8x8xf32>
    %cst_16 = arith.constant dense<0.000000e+00> : vector<8xf32>
    %68 = vector.multi_reduction <add>, %67, %cst_16 [1] : vector<8x8xf32> to vector<8xf32>
    %69 = vector.shape_cast %68 : vector<8xf32> to vector<8x1xf32>
    %70 = tpu.reciprocal %69 {approx = true} : vector<8x1xf32> -> vector<8x1xf32>
    %71 = vector.broadcast %70 : vector<8x1xf32> to vector<8x8xf32>
    %72 = arith.mulf %67, %71 : vector<8x8xf32>
    %73 = arith.truncf %72 : vector<8x8xf32> to vector<8x8xbf16>
    %cst_17 = arith.constant dense<0.000000e+00> : vector<8x8xf32>
    %74 = tpu.matmul %73, %56, %cst_17 {dimension_numbers = #tpu.dot_dimension_numbers<[1], [0], [0], [1], [0, 0, 1, 1], [], []>} : vector<8x8xbf16>, vector<8x8xbf16>, vector<8x8xf32> -> vector<8x8xf32>
    %75 = vector.extract_strided_slice %0 {offsets = [0, 24], sizes = [8, 8], strides = [1, 1]} : vector<8x96xf32> to vector<8x8xf32>
    %76 = arith.truncf %75 : vector<8x8xf32> to vector<8x8xbf16>
    %77 = vector.extract_strided_slice %0 {offsets = [0, 56], sizes = [8, 8], strides = [1, 1]} : vector<8x96xf32> to vector<8x8xf32>
    %78 = arith.truncf %77 : vector<8x8xf32> to vector<8x8xbf16>
    %79 = vector.extract_strided_slice %0 {offsets = [0, 88], sizes = [8, 8], strides = [1, 1]} : vector<8x96xf32> to vector<8x8xf32>
    %80 = arith.truncf %79 : vector<8x8xf32> to vector<8x8xbf16>
    %81 = tpu.transpose %78, [1, 0] : vector<8x8xbf16> -> vector<8x8xbf16>
    %cst_18 = arith.constant dense<0.000000e+00> : vector<8x8xf32>
    %82 = tpu.matmul %76, %81, %cst_18 {dimension_numbers = #tpu.dot_dimension_numbers<[1], [0], [0], [1], [0, 0, 1, 1], [], []>} : vector<8x8xbf16>, vector<8x8xbf16>, vector<8x8xf32> -> vector<8x8xf32>
    %cst_19 = arith.constant 0.353553385 : f32
    %83 = vector.broadcast %cst_19 : f32 to vector<8x8xf32>
    %84 = arith.mulf %82, %83 : vector<8x8xf32>
    %85 = vector.broadcast %2 : vector<1x8xf32> to vector<8x8xf32>
    %86 = arith.addf %84, %85 : vector<8x8xf32>
    %cst_20 = arith.constant dense<0xFF800000> : vector<8xf32>
    %87 = vector.multi_reduction <maximumf>, %86, %cst_20 [1] : vector<8x8xf32> to vector<8xf32>
    %88 = vector.shape_cast %87 : vector<8xf32> to vector<8x1xf32>
    %89 = vector.broadcast %88 : vector<8x1xf32> to vector<8x8xf32>
    %90 = arith.subf %86, %89 : vector<8x8xf32>
    %91 = math.exp %90 : vector<8x8xf32>
    %cst_21 = arith.constant dense<0.000000e+00> : vector<8xf32>
    %92 = vector.multi_reduction <add>, %91, %cst_21 [1] : vector<8x8xf32> to vector<8xf32>
    %93 = vector.shape_cast %92 : vector<8xf32> to vector<8x1xf32>
    %94 = tpu.reciprocal %93 {approx = true} : vector<8x1xf32> -> vector<8x1xf32>
    %95 = vector.broadcast %94 : vector<8x1xf32> to vector<8x8xf32>
    %96 = arith.mulf %91, %95 : vector<8x8xf32>
    %97 = arith.truncf %96 : vector<8x8xf32> to vector<8x8xbf16>
    %cst_22 = arith.constant dense<0.000000e+00> : vector<8x8xf32>
    %98 = tpu.matmul %97, %80, %cst_22 {dimension_numbers = #tpu.dot_dimension_numbers<[1], [0], [0], [1], [0, 0, 1, 1], [], []>} : vector<8x8xbf16>, vector<8x8xbf16>, vector<8x8xf32> -> vector<8x8xf32>
    %99 = tpu.concatenate %26, %50, %74, %98 in 1 : vector<8x8xf32>, vector<8x8xf32>, vector<8x8xf32>, vector<8x8xf32> -> vector<8x32xf32>
    %c0_23 = arith.constant 0 : index
    %c0_24 = arith.constant 0 : index
    %100 = vector.load %arg3[%c0_23, %c0_24] : memref<8x32xf32, #tpu.memory_space<vmem>>, vector<8x32xf32>
    tpu.vector_store %arg3[%c0_23, %c0_24], %99 {strides = array<i32>} : memref<8x32xf32, #tpu.memory_space<vmem>>, vector<8x32xf32>,
    return
  }
  func.func @transform_0(%arg0: i32) -> (i32, i32) {
    %c0_i32 = arith.constant 0 : i32
    %c0_i32_0 = arith.constant 0 : i32
    return %arg0, %c0_i32 : i32, i32
  }
  func.func @transform_1(%arg0: i32) -> (i32, i32, i32) {
    %c0_i32 = arith.constant 0 : i32
    %c0_i32_0 = arith.constant 0 : i32
    %c0_i32_1 = arith.constant 0 : i32
    return %arg0, %c0_i32, %c0_i32_0 : i32, i32, i32
  }
  func.func @transform_2(%arg0: i32) -> (i32, i32) {
    %c0_i32 = arith.constant 0 : i32
    %c0_i32_0 = arith.constant 0 : i32
    return %arg0, %c0_i32 : i32, i32
  }
}

module attributes {stable_mosaic.version = 11 : i64} {
  func.func @_linear_kernel(%arg0: i32, %arg1: i32, %arg2: i32, %arg3: memref<16x32xf32, #tpu.memory_space<vmem>>, %arg4: memref<32x64xbf16, #tpu.memory_space<vmem>>, %arg5: memref<1x64xf32, #tpu.memory_space<vmem>>, %arg6: memref<16x64xf32, #tpu.memory_space<vmem>>, %arg7: memref<16x64xf32, #tpu.memory_space<vmem>>) attributes {dimension_semantics = [#tpu.dimension_semantics<parallel>, #tpu.dimension_semantics<parallel>, #tpu.dimension_semantics<arbitrary>], iteration_bounds = array<i64: 1, 1, 1>, scalar_prefetch = 0 : i64, scratch_operands = 1 : i64, tpu.core_type = #tpu.core_type<tc>, window_params = [{transform_indices = @transform_0, window_bounds = array<i64: 16, 32>}, {transform_indices = @transform_1, window_bounds = array<i64: 32, 64>}, {transform_indices = @transform_2, window_bounds = array<i64: 1, 64>}, {transform_indices = @transform_3, window_bounds = array<i64: 16, 64>}]} {
    %c0_i32 = arith.constant 0 : i32
    %0 = arith.cmpi eq, %arg2, %c0_i32 : i32
    %1 = arith.extui %0 : i1 to i32
    %c0_i32_0 = arith.constant 0 : i32
    %2 = arith.cmpi ne, %1, %c0_i32_0 : i32
    scf.if %2 {
      %cst_10 = arith.constant 0.000000e+00 : f32
      %13 = vector.broadcast %cst_10 : f32 to vector<16x64xf32>
      %c0_11 = arith.constant 0 : index
      %c0_12 = arith.constant 0 : index
      %14 = vector.load %arg7[%c0_11, %c0_12] : memref<16x64xf32, #tpu.memory_space<vmem>>, vector<16x64xf32>
      tpu.vector_store %arg7[%c0_11, %c0_12], %13 {strides = array<i32>} : memref<16x64xf32, #tpu.memory_space<vmem>>, vector<16x64xf32>,
    } else {
    }
    %c0 = arith.constant 0 : index
    %c0_1 = arith.constant 0 : index
    %3 = vector.load %arg7[%c0, %c0_1] : memref<16x64xf32, #tpu.memory_space<vmem>>, vector<16x64xf32>
    %c0_2 = arith.constant 0 : index
    %c0_3 = arith.constant 0 : index
    %4 = vector.load %arg3[%c0_2, %c0_3] : memref<16x32xf32, #tpu.memory_space<vmem>>, vector<16x32xf32>
    %5 = arith.truncf %4 : vector<16x32xf32> to vector<16x32xbf16>
    %c0_4 = arith.constant 0 : index
    %c0_5 = arith.constant 0 : index
    %6 = vector.load %arg4[%c0_4, %c0_5] : memref<32x64xbf16, #tpu.memory_space<vmem>>, vector<32x64xbf16>
    %cst = arith.constant dense<0.000000e+00> : vector<16x64xf32>
    %7 = tpu.matmul %5, %6, %cst {dimension_numbers = #tpu.dot_dimension_numbers<[1], [0], [0], [1], [0, 0, 1, 1], [], []>} : vector<16x32xbf16>, vector<32x64xbf16>, vector<16x64xf32> -> vector<16x64xf32>
    %8 = arith.addf %3, %7 : vector<16x64xf32>
    %c0_6 = arith.constant 0 : index
    %c0_7 = arith.constant 0 : index
    %9 = vector.load %arg7[%c0_6, %c0_7] : memref<16x64xf32, #tpu.memory_space<vmem>>, vector<16x64xf32>
    tpu.vector_store %arg7[%c0_6, %c0_7], %8 {strides = array<i32>} : memref<16x64xf32, #tpu.memory_space<vmem>>, vector<16x64xf32>,
    %c0_i32_8 = arith.constant 0 : i32
    %10 = arith.cmpi eq, %arg2, %c0_i32_8 : i32
    %11 = arith.extui %10 : i1 to i32
    %c0_i32_9 = arith.constant 0 : i32
    %12 = arith.cmpi ne, %11, %c0_i32_9 : i32
    scf.if %12 {
      %c0_10 = arith.constant 0 : index
      %c0_11 = arith.constant 0 : index
      %13 = vector.load %arg7[%c0_10, %c0_11] : memref<16x64xf32, #tpu.memory_space<vmem>>, vector<16x64xf32>
      %c0_12 = arith.constant 0 : index
      %c0_13 = arith.constant 0 : index
      %14 = vector.load %arg5[%c0_12, %c0_13] : memref<1x64xf32, #tpu.memory_space<vmem>>, vector<1x64xf32>
      %15 = vector.broadcast %14 : vector<1x64xf32> to vector<16x64xf32>
      %16 = arith.addf %13, %15 : vector<16x64xf32>
      %cst_14 = arith.constant 5.000000e-01 : f32
      %17 = vector.broadcast %cst_14 : f32 to vector<16x64xf32>
      %18 = arith.mulf %17, %16 : vector<16x64xf32>
      %cst_15 = arith.constant 4.471500e-02 : f32
      %19 = vector.broadcast %cst_15 : f32 to vector<16x64xf32>
      %20 = arith.mulf %19, %16 : vector<16x64xf32>
      %21 = arith.mulf %20, %16 : vector<16x64xf32>
      %22 = arith.mulf %21, %16 : vector<16x64xf32>
      %23 = arith.addf %16, %22 : vector<16x64xf32>
      %cst_16 = arith.constant 0.797884583 : f32
      %24 = vector.broadcast %cst_16 : f32 to vector<16x64xf32>
      %25 = arith.mulf %24, %23 : vector<16x64xf32>
      %26 = math.tanh %25 : vector<16x64xf32>
      %cst_17 = arith.constant 1.000000e+00 : f32
      %27 = vector.broadcast %cst_17 : f32 to vector<16x64xf32>
      %28 = arith.addf %27, %26 : vector<16x64xf32>
      %29 = arith.mulf %18, %28 : vector<16x64xf32>
      %c0_18 = arith.constant 0 : index
      %c0_19 = arith.constant 0 : index
      %30 = vector.load %arg6[%c0_18, %c0_19] : memref<16x64xf32, #tpu.memory_space<vmem>>, vector<16x64xf32>
      tpu.vector_store %arg6[%c0_18, %c0_19], %29 {strides = array<i32>} : memref<16x64xf32, #tpu.memory_space<vmem>>, vector<16x64xf32>,
    } else {
    }
    return
  }
  func.func @transform_0(%arg0: i32, %arg1: i32, %arg2: i32) -> (i32, i32) {
    %c0_i32 = arith.constant 0 : i32
    return %arg0, %arg2 : i32, i32
  }
  func.func @transform_1(%arg0: i32, %arg1: i32, %arg2: i32) -> (i32, i32) {
    %c0_i32 = arith.constant 0 : i32
    return %arg2, %arg1 : i32, i32
  }
  func.func @transform_2(%arg0: i32, %arg1: i32, %arg2: i32) -> (i32, i32) {
    %c0_i32 = arith.constant 0 : i32
    %c0_i32_0 = arith.constant 0 : i32
    return %c0_i32, %arg1 : i32, i32
  }
  func.func @transform_3(%arg0: i32, %arg1: i32, %arg2: i32) -> (i32, i32) {
    %c0_i32 = arith.constant 0 : i32
    return %arg0, %arg1 : i32, i32
  }
}

module attributes {stable_mosaic.version = 11 : i64} {
  func.func @_proj_res_ln_kernel(%arg0: i32, %arg1: i32, %arg2: memref<16x64xf32, #tpu.memory_space<vmem>>, %arg3: memref<64x32xbf16, #tpu.memory_space<vmem>>, %arg4: memref<1x32xf32, #tpu.memory_space<vmem>>, %arg5: memref<16x32xf32, #tpu.memory_space<vmem>>, %arg6: memref<1x32xf32, #tpu.memory_space<vmem>>, %arg7: memref<1x32xf32, #tpu.memory_space<vmem>>, %arg8: memref<16x32xf32, #tpu.memory_space<vmem>>, %arg9: memref<16x32xf32, #tpu.memory_space<vmem>>) attributes {dimension_semantics = [#tpu.dimension_semantics<parallel>, #tpu.dimension_semantics<arbitrary>], iteration_bounds = array<i64: 1, 1>, scalar_prefetch = 0 : i64, scratch_operands = 1 : i64, tpu.core_type = #tpu.core_type<tc>, window_params = [{transform_indices = @transform_0, window_bounds = array<i64: 16, 64>}, {transform_indices = @transform_1, window_bounds = array<i64: 64, 32>}, {pipeline_mode = #tpu.pipeline_mode<synchronous>, transform_indices = @transform_2, window_bounds = array<i64: 1, 32>}, {transform_indices = @transform_3, window_bounds = array<i64: 16, 32>}, {pipeline_mode = #tpu.pipeline_mode<synchronous>, transform_indices = @transform_4, window_bounds = array<i64: 1, 32>}, {pipeline_mode = #tpu.pipeline_mode<synchronous>, transform_indices = @transform_5, window_bounds = array<i64: 1, 32>}, {transform_indices = @transform_6, window_bounds = array<i64: 16, 32>}]} {
    %c0_i32 = arith.constant 0 : i32
    %0 = arith.cmpi eq, %arg1, %c0_i32 : i32
    %1 = arith.extui %0 : i1 to i32
    %c0_i32_0 = arith.constant 0 : i32
    %2 = arith.cmpi ne, %1, %c0_i32_0 : i32
    scf.if %2 {
      %cst_10 = arith.constant 0.000000e+00 : f32
      %13 = vector.broadcast %cst_10 : f32 to vector<16x32xf32>
      %c0_11 = arith.constant 0 : index
      %c0_12 = arith.constant 0 : index
      %14 = vector.load %arg9[%c0_11, %c0_12] : memref<16x32xf32, #tpu.memory_space<vmem>>, vector<16x32xf32>
      tpu.vector_store %arg9[%c0_11, %c0_12], %13 {strides = array<i32>} : memref<16x32xf32, #tpu.memory_space<vmem>>, vector<16x32xf32>,
    } else {
    }
    %c0 = arith.constant 0 : index
    %c0_1 = arith.constant 0 : index
    %3 = vector.load %arg9[%c0, %c0_1] : memref<16x32xf32, #tpu.memory_space<vmem>>, vector<16x32xf32>
    %c0_2 = arith.constant 0 : index
    %c0_3 = arith.constant 0 : index
    %4 = vector.load %arg2[%c0_2, %c0_3] : memref<16x64xf32, #tpu.memory_space<vmem>>, vector<16x64xf32>
    %5 = arith.truncf %4 : vector<16x64xf32> to vector<16x64xbf16>
    %c0_4 = arith.constant 0 : index
    %c0_5 = arith.constant 0 : index
    %6 = vector.load %arg3[%c0_4, %c0_5] : memref<64x32xbf16, #tpu.memory_space<vmem>>, vector<64x32xbf16>
    %cst = arith.constant dense<0.000000e+00> : vector<16x32xf32>
    %7 = tpu.matmul %5, %6, %cst {dimension_numbers = #tpu.dot_dimension_numbers<[1], [0], [0], [1], [0, 0, 1, 1], [], []>} : vector<16x64xbf16>, vector<64x32xbf16>, vector<16x32xf32> -> vector<16x32xf32>
    %8 = arith.addf %3, %7 : vector<16x32xf32>
    %c0_6 = arith.constant 0 : index
    %c0_7 = arith.constant 0 : index
    %9 = vector.load %arg9[%c0_6, %c0_7] : memref<16x32xf32, #tpu.memory_space<vmem>>, vector<16x32xf32>
    tpu.vector_store %arg9[%c0_6, %c0_7], %8 {strides = array<i32>} : memref<16x32xf32, #tpu.memory_space<vmem>>, vector<16x32xf32>,
    %c0_i32_8 = arith.constant 0 : i32
    %10 = arith.cmpi eq, %arg1, %c0_i32_8 : i32
    %11 = arith.extui %10 : i1 to i32
    %c0_i32_9 = arith.constant 0 : i32
    %12 = arith.cmpi ne, %11, %c0_i32_9 : i32
    scf.if %12 {
      %c0_10 = arith.constant 0 : index
      %c0_11 = arith.constant 0 : index
      %13 = vector.load %arg9[%c0_10, %c0_11] : memref<16x32xf32, #tpu.memory_space<vmem>>, vector<16x32xf32>
      %c0_12 = arith.constant 0 : index
      %c0_13 = arith.constant 0 : index
      %14 = vector.load %arg4[%c0_12, %c0_13] : memref<1x32xf32, #tpu.memory_space<vmem>>, vector<1x32xf32>
      %15 = vector.broadcast %14 : vector<1x32xf32> to vector<16x32xf32>
      %16 = arith.addf %13, %15 : vector<16x32xf32>
      %c0_14 = arith.constant 0 : index
      %c0_15 = arith.constant 0 : index
      %17 = vector.load %arg5[%c0_14, %c0_15] : memref<16x32xf32, #tpu.memory_space<vmem>>, vector<16x32xf32>
      %18 = arith.addf %16, %17 : vector<16x32xf32>
      %cst_16 = arith.constant dense<0.000000e+00> : vector<16xf32>
      %19 = vector.multi_reduction <add>, %18, %cst_16 [1] : vector<16x32xf32> to vector<16xf32>
      %20 = vector.shape_cast %19 : vector<16xf32> to vector<16x1xf32>
      %cst_17 = arith.constant 3.200000e+01 : f32
      %21 = vector.broadcast %cst_17 : f32 to vector<16x1xf32>
      %22 = arith.divf %20, %21 : vector<16x1xf32>
      %23 = vector.broadcast %22 : vector<16x1xf32> to vector<16x32xf32>
      %24 = arith.subf %18, %23 : vector<16x32xf32>
      %25 = arith.mulf %24, %24 : vector<16x32xf32>
      %cst_18 = arith.constant dense<0.000000e+00> : vector<16xf32>
      %26 = vector.multi_reduction <add>, %25, %cst_18 [1] : vector<16x32xf32> to vector<16xf32>
      %27 = vector.shape_cast %26 : vector<16xf32> to vector<16x1xf32>
      %cst_19 = arith.constant 3.200000e+01 : f32
      %28 = vector.broadcast %cst_19 : f32 to vector<16x1xf32>
      %29 = arith.divf %27, %28 : vector<16x1xf32>
      %cst_20 = arith.constant 9.99999996E-13 : f32
      %30 = vector.broadcast %cst_20 : f32 to vector<16x1xf32>
      %31 = arith.addf %29, %30 : vector<16x1xf32>
      %32 = math.rsqrt %31 : vector<16x1xf32>
      %33 = vector.broadcast %32 : vector<16x1xf32> to vector<16x32xf32>
      %34 = arith.mulf %24, %33 : vector<16x32xf32>
      %c0_21 = arith.constant 0 : index
      %c0_22 = arith.constant 0 : index
      %35 = vector.load %arg6[%c0_21, %c0_22] : memref<1x32xf32, #tpu.memory_space<vmem>>, vector<1x32xf32>
      %36 = vector.broadcast %35 : vector<1x32xf32> to vector<16x32xf32>
      %37 = arith.mulf %34, %36 : vector<16x32xf32>
      %c0_23 = arith.constant 0 : index
      %c0_24 = arith.constant 0 : index
      %38 = vector.load %arg7[%c0_23, %c0_24] : memref<1x32xf32, #tpu.memory_space<vmem>>, vector<1x32xf32>
      %39 = vector.broadcast %38 : vector<1x32xf32> to vector<16x32xf32>
      %40 = arith.addf %37, %39 : vector<16x32xf32>
      %c0_25 = arith.constant 0 : index
      %c0_26 = arith.constant 0 : index
      %41 = vector.load %arg8[%c0_25, %c0_26] : memref<16x32xf32, #tpu.memory_space<vmem>>, vector<16x32xf32>
      tpu.vector_store %arg8[%c0_25, %c0_26], %40 {strides = array<i32>} : memref<16x32xf32, #tpu.memory_space<vmem>>, vector<16x32xf32>,
    } else {
    }
    return
  }
  func.func @transform_0(%arg0: i32, %arg1: i32) -> (i32, i32) {
    %c0_i32 = arith.constant 0 : i32
    return %arg0, %arg1 : i32, i32
  }
  func.func @transform_1(%arg0: i32, %arg1: i32) -> (i32, i32) {
    %c0_i32 = arith.constant 0 : i32
    %c0_i32_0 = arith.constant 0 : i32
    return %arg1, %c0_i32 : i32, i32
  }
  func.func @transform_2(%arg0: i32, %arg1: i32) -> (i32, i32) {
    %c0_i32 = arith.constant 0 : i32
    %c0_i32_0 = arith.constant 0 : i32
    %c0_i32_1 = arith.constant 0 : i32
    return %c0_i32, %c0_i32_0 : i32, i32
  }
  func.func @transform_3(%arg0: i32, %arg1: i32) -> (i32, i32) {
    %c0_i32 = arith.constant 0 : i32
    %c0_i32_0 = arith.constant 0 : i32
    return %arg0, %c0_i32 : i32, i32
  }
  func.func @transform_4(%arg0: i32, %arg1: i32) -> (i32, i32) {
    %c0_i32 = arith.constant 0 : i32
    %c0_i32_0 = arith.constant 0 : i32
    %c0_i32_1 = arith.constant 0 : i32
    return %c0_i32, %c0_i32_0 : i32, i32
  }
  func.func @transform_5(%arg0: i32, %arg1: i32) -> (i32, i32) {
    %c0_i32 = arith.constant 0 : i32
    %c0_i32_0 = arith.constant 0 : i32
    %c0_i32_1 = arith.constant 0 : i32
    return %c0_i32, %c0_i32_0 : i32, i32
  }
  func.func @transform_6(%arg0: i32, %arg1: i32) -> (i32, i32) {
    %c0_i32 = arith.constant 0 : i32
    %c0_i32_0 = arith.constant 0 : i32
    return %arg0, %c0_i32 : i32, i32
  }
}

module attributes {stable_mosaic.version = 11 : i64} {
  func.func @_pooler_head_kernel(%arg0: i32, %arg1: memref<2x32xf32, #tpu.memory_space<vmem>>, %arg2: memref<32x32xbf16, #tpu.memory_space<vmem>>, %arg3: memref<1x32xf32, #tpu.memory_space<vmem>>, %arg4: memref<32x3xbf16, #tpu.memory_space<vmem>>, %arg5: memref<1x3xf32, #tpu.memory_space<vmem>>, %arg6: memref<2x3xf32, #tpu.memory_space<vmem>>) attributes {dimension_semantics = [#tpu.dimension_semantics<arbitrary>], iteration_bounds = array<i64: 1>, scalar_prefetch = 0 : i64, scratch_operands = 0 : i64, tpu.core_type = #tpu.core_type<tc>, window_params = [{pipeline_mode = #tpu.pipeline_mode<synchronous>, transform_indices = @transform_0, window_bounds = array<i64: 2, 32>}, {pipeline_mode = #tpu.pipeline_mode<synchronous>, transform_indices = @transform_1, window_bounds = array<i64: 32, 32>}, {pipeline_mode = #tpu.pipeline_mode<synchronous>, transform_indices = @transform_2, window_bounds = array<i64: 1, 32>}, {pipeline_mode = #tpu.pipeline_mode<synchronous>, transform_indices = @transform_3, window_bounds = array<i64: 32, 3>}, {pipeline_mode = #tpu.pipeline_mode<synchronous>, transform_indices = @transform_4, window_bounds = array<i64: 1, 3>}, {pipeline_mode = #tpu.pipeline_mode<synchronous>, transform_indices = @transform_5, window_bounds = array<i64: 2, 3>}]} {
    %c0 = arith.constant 0 : index
    %c0_0 = arith.constant 0 : index
    %0 = vector.load %arg1[%c0, %c0_0] : memref<2x32xf32, #tpu.memory_space<vmem>>, vector<2x32xf32>
    %1 = arith.truncf %0 : vector<2x32xf32> to vector<2x32xbf16>
    %c0_1 = arith.constant 0 : index
    %c0_2 = arith.constant 0 : index
    %2 = vector.load %arg2[%c0_1, %c0_2] : memref<32x32xbf16, #tpu.memory_space<vmem>>, vector<32x32xbf16>
    %cst = arith.constant dense<0.000000e+00> : vector<2x32xf32>
    %3 = tpu.matmul %1, %2, %cst {dimension_numbers = #tpu.dot_dimension_numbers<[1], [0], [0], [1], [0, 0, 1, 1], [], []>} : vector<2x32xbf16>, vector<32x32xbf16>, vector<2x32xf32> -> vector<2x32xf32>
    %c0_3 = arith.constant 0 : index
    %c0_4 = arith.constant 0 : index
    %4 = vector.load %arg3[%c0_3, %c0_4] : memref<1x32xf32, #tpu.memory_space<vmem>>, vector<1x32xf32>
    %5 = vector.broadcast %4 : vector<1x32xf32> to vector<2x32xf32>
    %6 = arith.addf %3, %5 : vector<2x32xf32>
    %7 = math.tanh %6 : vector<2x32xf32>
    %8 = arith.truncf %7 : vector<2x32xf32> to vector<2x32xbf16>
    %c0_5 = arith.constant 0 : index
    %c0_6 = arith.constant 0 : index
    %9 = vector.load %arg4[%c0_5, %c0_6] : memref<32x3xbf16, #tpu.memory_space<vmem>>, vector<32x3xbf16>
    %cst_7 = arith.constant dense<0.000000e+00> : vector<2x3xf32>
    %10 = tpu.matmul %8, %9, %cst_7 {dimension_numbers = #tpu.dot_dimension_numbers<[1], [0], [0], [1], [0, 0, 1, 1], [], []>} : vector<2x32xbf16>, vector<32x3xbf16>, vector<2x3xf32> -> vector<2x3xf32>
    %c0_8 = arith.constant 0 : index
    %c0_9 = arith.constant 0 : index
    %11 = vector.load %arg5[%c0_8, %c0_9] : memref<1x3xf32, #tpu.memory_space<vmem>>, vector<1x3xf32>
    %12 = vector.broadcast %11 : vector<1x3xf32> to vector<2x3xf32>
    %13 = arith.addf %10, %12 : vector<2x3xf32>
    %c0_10 = arith.constant 0 : index
    %c0_11 = arith.constant 0 : index
    %14 = vector.load %arg6[%c0_10, %c0_11] : memref<2x3xf32, #tpu.memory_space<vmem>>, vector<2x3xf32>
    tpu.vector_store %arg6[%c0_10, %c0_11], %13 {strides = array<i32>} : memref<2x3xf32, #tpu.memory_space<vmem>>, vector<2x3xf32>,
    return
  }
  func.func @transform_0(%arg0: i32) -> (i32, i32) {
    %c0_i32 = arith.constant 0 : i32
    %c0_i32_0 = arith.constant 0 : i32
    %c0_i32_1 = arith.constant 0 : i32
    return %c0_i32, %c0_i32_0 : i32, i32
  }
  func.func @transform_1(%arg0: i32) -> (i32, i32) {
    %c0_i32 = arith.constant 0 : i32
    %c0_i32_0 = arith.constant 0 : i32
    %c0_i32_1 = arith.constant 0 : i32
    return %c0_i32, %c0_i32_0 : i32, i32
  }
  func.func @transform_2(%arg0: i32) -> (i32, i32) {
    %c0_i32 = arith.constant 0 : i32
    %c0_i32_0 = arith.constant 0 : i32
    %c0_i32_1 = arith.constant 0 : i32
    return %c0_i32, %c0_i32_0 : i32, i32
  }
  func.func @transform_3(%arg0: i32) -> (i32, i32) {
    %c0_i32 = arith.constant 0 : i32
    %c0_i32_0 = arith.constant 0 : i32
    %c0_i32_1 = arith.constant 0 : i32
    return %c0_i32, %c0_i32_0 : i32, i32
  }
  func.func @transform_4(%arg0: i32) -> (i32, i32) {
    %c0_i32 = arith.constant 0 : i32
    %c0_i32_0 = arith.constant 0 : i32
    %c0_i32_1 = arith.constant 0 : i32
    return %c0_i32, %c0_i32_0 : i32, i32
  }
  func.func @transform_5(%arg0: i32) -> (i32, i32) {
    %c0_i32 = arith.constant 0 : i32
    %c0_i32_0 = arith.constant 0 : i32
    %c0_i32_1 = arith.constant 0 : i32
    return %c0_i32, %c0_i32_0 : i32, i32
  }
}

</mosaic_0001>

<bundles_post_ra>
// kernel: fwd.12
= control target key start
LH: loop header
LB: loop body
LE: loop exit
PB: predicated region body
PF: predicated region fallthrough
CT: control target
= control target key end

     0   :  { %vm16_vm0 = vcmask 261120   ;;  %s118_s0 = inlined_call_operand.vmem [shape: f32[16,32], index: 0, kind: input, shape index: {}]   ;;  %s119_s1 = inlined_call_operand.vmem [shape: f32[1,32], index: 1, kind: input, shape index: {}]   ;;  %s120_s2 = inlined_call_operand.vmem [shape: f32[1,32], index: 2, kind: input, shape index: {}]   ;;  %s121_s3 = inlined_call_operand.vmem [shape: f32[16,32], index: 3, kind: output, shape index: {}]  }
   0x1   :  { %v14_v0 = vld [vmem:[%s118_s0] sm:$0xff]  ;;  %v15_v1 = vld [vmem:[%s118_s0 + $0x8] sm:$0xff] }
   0x2   :  { %v17_v2 = vsel %vm16_vm0, %v14_v0, 0.0  ;;  %v20_v3 = vsel %vm16_vm0, %v15_v1, 0.0  ;;  %v68_v21 = vld [vmem:[%s119_s1] ss:$0 sm:$0xff] }
   0x3   :  { %18 = vadd.xlane.f32.xlu0 %v17_v2  ;;  %v69_v23 = vld [vmem:[%s120_s2] ss:$0 sm:$0xff] }
   0x7   :  { %21 = vadd.xlane.f32.xlu0 %v20_v3 }
  0x8c   :  { %v19_v4 = vpop.xlane.xlu0 %18 }
  0x8d   :  { %v24_v5 = vmul.f32 0.03125, %v19_v4 }
  0x8f   :  { %v26_v6 = vsub.f32 %v14_v0, %v24_v5 }
  0x90   :  { %v22_v7 = vpop.xlane.xlu0 %21 }
  0x91   :  { %v25_v8 = vmul.f32 0.03125, %v22_v7  ;;  %v28_v9 = vmul.f32 %v26_v6, %v26_v6 }
  0x93   :  { %v27_v10 = vsub.f32 %v15_v1, %v25_v8  ;;  %v30_v11 = vsel %vm16_vm0, %v28_v9, 0.0 }
  0x94   :  { %31 = vadd.xlane.f32.xlu1 %v30_v11 }
  0x95   :  { %v29_v12 = vmul.f32 %v27_v10, %v27_v10 }
  0x97   :  { %v33_v13 = vsel %vm16_vm0, %v29_v12, 0.0 }
  0x98   :  { %34 = vadd.xlane.f32.xlu1 %v33_v13 }
 0x11d   :  { %v32_v14 = vpop.xlane.xlu1 %31 }
 0x11e   :  { %v36_v15 = vmul.f32 0.03125, %v32_v14 }
 0x120   :  { %v38_v16 = vadd.f32 1e-12, %v36_v15 }
 0x121   :  { %v35_v17 = vpop.xlane.xlu1 %34 }
 0x122   :  { %70 = vrsqrt.f32 %v38_v16  ;;  %v37_v18 = vmul.f32 0.03125, %v35_v17 }
 0x124   :  { %v39_v19 = vadd.f32 1e-12, %v37_v18 }
 0x126   :  { %72 = vrsqrt.f32 %v39_v19 }
 0x12f   :  { %v71_v20 = vpop.eup %70 }
 0x130   :  { %v42_v22 = vmul.f32 %v71_v20, %v26_v6 }
 0x132   :  { %v51_v24 = vmul.f32 %v68_v21, %v42_v22 }
 0x133   :  { %v73_v25 = vpop.eup %72 }
 0x134   :  { %v60_v26 = vadd.f32 %v69_v23, %v51_v24  ;;  %v43_v27 = vmul.f32 %v73_v25, %v27_v10 }
 0x136   :  { %62 = vst.msk [vmem:[%s121_s3] sm:$0xff] %vm16_vm0, %v60_v26  ;;  %v52_v28 = vmul.f32 %v68_v21, %v43_v27 }
 0x138   :  { %v61_v29 = vadd.f32 %v69_v23, %v52_v28 }
 0x13a   :  { %63 = vst.msk [vmem:[%s121_s3 + $0x8] sm:$0xff] %vm16_vm0, %v61_v29 }

// kernel: fwd.15
= control target key start
LH: loop header
LB: loop body
LE: loop exit
PB: predicated region body
PF: predicated region fallthrough
CT: control target
= control target key end

     0   :  { %vm28_vm0 = vcmask 261120   ;;  %v195_v0 = vmov 0.0   ;;  %vm196_vm1 = vmmov 0   ;;  %s276_s1 = inlined_call_operand.vmem [shape: bf16[32,32], index: 1, kind: input, shape index: {}]   ;;  %s277_s0 = inlined_call_operand.vmem [shape: f32[16,32], index: 0, kind: input, shape index: {}]   ;;  %s278_s2 = inlined_call_operand.vmem [shape: f32[1,32], index: 2, kind: input, shape index: {}]   ;;  %s279_s3 = inlined_call_operand.vmem [shape: f32[16,32], index: 3, kind: input, shape index: {}]   ;;  %s280_s4 = inlined_call_operand.vmem [shape: f32[1,32], index: 4, kind: input, shape index: {}]   ;;  %s281_s5 = inlined_call_operand.vmem [shape: f32[1,32], index: 5, kind: input, shape index: {}]   ;;  %s282_s6 = inlined_call_operand.vmem [shape: f32[16,32], index: 6, kind: output, shape index: {}]  }
   0x1   :  { %179 = vmatprep.subr.bf16.mxu0 %v195_v0  ;;  %v189_v1 = vld [vmem:[%s276_s1 + $0x8] sm:$0xff]   ;;  %183 = vmatprep.mubr.msk.bf16.mxu0 %vm196_vm1, %v195_v0  ;;  %29 = vst.msk [vmem:[#allocation2] sm:$0xff] %vm28_vm0, %v195_v0  ;;  %30 = vst.msk [vmem:[#allocation2 + $0x8] sm:$0xff] %vm28_vm0, %v195_v0  ;;  %v190_v2 = vld [vmem:[%s276_s1] sm:$0xff]  }
   0x2   :  { %180 = vmatpush3.bf16.msra.mxu0 %v189_v1  ;;  %v33_v3 = vld [vmem:[%s277_s0] sm:$0xff]  ;;  %v34_v4 = vld [vmem:[%s277_s0 + $0x8] sm:$0xff] }
   0x3   :  { %181 = vmatprep.subr.bf16.mxu0 %v195_v0  ;;  %v35_v5 = vpack.c.bf16 %v34_v4, %v33_v3  ;;  %v173_v14 = vld [vmem:[%s278_s2] ss:$0 sm:$0xff]  ;;  %v116_v20 = vld [vmem:[%s279_s3 + $0x8] sm:$0xff] }
   0x4   :  { %v115_v16 = vld [vmem:[%s279_s3] sm:$0xff] }
   0x5   :  { %v174_v42 = vld [vmem:[%s280_s4] ss:$0 sm:$0xff] }
   0x6   :  { %182 = vmatpush3.bf16.msra.mxu0 %v190_v2  ;;  %v175_v44 = vld [vmem:[%s281_s5] ss:$0 sm:$0xff] }
   0x8   :  { %v31_v6 = vld [vmem:[#allocation2] sm:$0xff]  ;;  %v32_v10 = vld [vmem:[#allocation2 + $0x8] sm:$0xff] }
   0x9   :  { %184 = vmatmul.mubr.msk.bf16.vlgmr.msra.gmra.mxu0 %vm28_vm0, %v35_v5 }
  0xc9   :  { %v90_v7 = vpop.f32.mrf.mxu0 }
  0xca   :  { %v97_v8 = vadd.f32 %v90_v7, %v31_v6 }
  0xcb   :  { %v185_v9 = vpop.f32.mrf.mxu0 }
  0xcc   :  { %99 = vst.msk [vmem:[#allocation2] sm:$0xff] %vm28_vm0, %v97_v8 }
  0xcd   :  { %v93_v11 = vpop.f32.mrf.mxu0 }
  0xce   :  { %v98_v12 = vadd.f32 %v93_v11, %v32_v10 }
  0xcf   :  { %v186_v13 = vpop.f32.mrf.mxu0 }
  0xd0   :  { %100 = vst.msk [vmem:[#allocation2 + $0x8] sm:$0xff] %vm28_vm0, %v98_v12 }
  0xd3   :  { %v104_v15 = vld [vmem:[#allocation2] sm:$0xff] }
  0xd4   :  { %v113_v17 = vadd.f32 %v173_v14, %v104_v15 }
  0xd6   :  { %v117_v18 = vadd.f32 %v115_v16, %v113_v17 }
  0xd7   :  { %v105_v19 = vld [vmem:[#allocation2 + $0x8] sm:$0xff] }
  0xd8   :  { %v119_v21 = vsel %vm28_vm0, %v117_v18, 0.0  ;;  %v114_v22 = vadd.f32 %v173_v14, %v105_v19 }
  0xd9   :  { %120 = vadd.xlane.f32.xlu0 %v119_v21 }
  0xda   :  { %v118_v23 = vadd.f32 %v116_v20, %v114_v22 }
  0xdc   :  { %v122_v24 = vsel %vm28_vm0, %v118_v23, 0.0 }
  0xdd   :  { %123 = vadd.xlane.f32.xlu0 %v122_v24 }
 0x162   :  { %v121_v25 = vpop.xlane.xlu0 %120 }
 0x163   :  { %v126_v26 = vmul.f32 0.03125, %v121_v25 }
 0x165   :  { %v128_v27 = vsub.f32 %v117_v18, %v126_v26 }
 0x166   :  { %v124_v28 = vpop.xlane.xlu0 %123 }
 0x167   :  { %v127_v29 = vmul.f32 0.03125, %v124_v28  ;;  %v130_v30 = vmul.f32 %v128_v27, %v128_v27 }
 0x169   :  { %v129_v31 = vsub.f32 %v118_v23, %v127_v29  ;;  %v132_v32 = vsel %vm28_vm0, %v130_v30, 0.0 }
 0x16a   :  { %133 = vadd.xlane.f32.xlu1 %v132_v32 }
 0x16b   :  { %v131_v33 = vmul.f32 %v129_v31, %v129_v31 }
 0x16d   :  { %v135_v34 = vsel %vm28_vm0, %v131_v33, 0.0 }
 0x16e   :  { %136 = vadd.xlane.f32.xlu1 %v135_v34 }
 0x1f3   :  { %v134_v35 = vpop.xlane.xlu1 %133 }
 0x1f4   :  { %v138_v36 = vmul.f32 0.03125, %v134_v35 }
 0x1f6   :  { %v140_v37 = vadd.f32 1e-12, %v138_v36 }
 0x1f7   :  { %v137_v38 = vpop.xlane.xlu1 %136 }
 0x1f8   :  { %191 = vrsqrt.f32 %v140_v37  ;;  %v139_v39 = vmul.f32 0.03125, %v137_v38 }
 0x1fa   :  { %v141_v40 = vadd.f32 1e-12, %v139_v39 }
 0x1fc   :  { %193 = vrsqrt.f32 %v141_v40 }
 0x205   :  { %v192_v41 = vpop.eup %191 }
 0x206   :  { %v144_v43 = vmul.f32 %v192_v41, %v128_v27 }
 0x208   :  { %v153_v45 = vmul.f32 %v174_v42, %v144_v43 }
 0x209   :  { %v194_v46 = vpop.eup %193 }
 0x20a   :  { %v162_v47 = vadd.f32 %v175_v44, %v153_v45  ;;  %v145_v48 = vmul.f32 %v194_v46, %v129_v31 }
 0x20c   :  { %164 = vst.msk [vmem:[%s282_s6] sm:$0xff] %vm28_vm0, %v162_v47  ;;  %v154_v49 = vmul.f32 %v174_v42, %v145_v48 }
 0x20e   :  { %v163_v50 = vadd.f32 %v175_v44, %v154_v49 }
 0x210   :  { %165 = vst.msk [vmem:[%s282_s6 + $0x8] sm:$0xff] %vm28_vm0, %v163_v50 }

// kernel: fwd.13
= control target key start
LH: loop header
LB: loop body
LE: loop exit
PB: predicated region body
PF: predicated region fallthrough
CT: control target
= control target key end

     0   :  { %vm19_vm0 = vcmask 785408   ;;  %v132_v0 = vmov 0.0   ;;  %vm133_vm1 = vmmov 0   ;;  %vm43_vm2 = vcmask 261120   ;;  %s181_s1 = inlined_call_operand.vmem [shape: bf16[32,96], index: 1, kind: input, shape index: {}]   ;;  %s182_s0 = inlined_call_operand.vmem [shape: f32[16,32], index: 0, kind: input, shape index: {}]   ;;  %s183_s2 = inlined_call_operand.vmem [shape: f32[1,96], index: 2, kind: input, shape index: {}]   ;;  %s184_s3 = inlined_call_operand.vmem [shape: f32[16,96], index: 3, kind: output, shape index: {}]  }
   0x1   :  { %120 = vmatprep.subr.bf16.mxu0 %v132_v0  ;;  %v130_v1 = vld [vmem:[%s181_s1 + $0x8] sm:$0xff]   ;;  %124 = vmatprep.mubr.msk.bf16.mxu0 %vm133_vm1, %v132_v0  ;;  %20 = vst.msk [vmem:[#allocation2] sm:$0xff] %vm19_vm0, %v132_v0  ;;  %21 = vst.msk [vmem:[#allocation2 + $0x8] sm:$0xff] %vm19_vm0, %v132_v0  ;;  %v131_v2 = vld [vmem:[%s181_s1] sm:$0xff]  }
   0x2   :  { %121 = vmatpush3.bf16.msra.mxu0 %v130_v1  ;;  %v24_v3 = vld [vmem:[%s182_s0] sm:$0xff]  ;;  %v25_v4 = vld [vmem:[%s182_s0 + $0x8] sm:$0xff] }
   0x3   :  { %122 = vmatprep.subr.bf16.mxu0 %v132_v0  ;;  %v26_v5 = vpack.c.bf16 %v25_v4, %v24_v3  ;;  %v116_v14 = vld [vmem:[%s183_s2] ss:$0 sm:$0xff] }
   0x6   :  { %123 = vmatpush3.bf16.msra.mxu0 %v131_v2 }
   0x8   :  { %v22_v6 = vld [vmem:[#allocation2] sm:$0xff]  ;;  %v23_v10 = vld [vmem:[#allocation2 + $0x8] sm:$0xff] }
   0x9   :  { %125 = vmatmul.mubr.msk.bf16.vlgmr.msra.gmra.mxu0 %vm43_vm2, %v26_v5 }
  0xc9   :  { %v81_v7 = vpop.f32.mrf.mxu0 }
  0xca   :  { %v88_v8 = vadd.f32 %v81_v7, %v22_v6 }
  0xcb   :  { %v126_v9 = vpop.f32.mrf.mxu0 }
  0xcc   :  { %91 = vst.msk [vmem:[#allocation2] sm:$0xff] %vm19_vm0, %v88_v8 }
  0xcd   :  { %v84_v11 = vpop.f32.mrf.mxu0 }
  0xce   :  { %v89_v12 = vadd.f32 %v84_v11, %v23_v10 }
  0xcf   :  { %v127_v13 = vpop.f32.mrf.mxu0 }
  0xd0   :  { %92 = vst.msk [vmem:[#allocation2 + $0x8] sm:$0xff] %vm19_vm0, %v89_v12 }
  0xd3   :  { %v96_v15 = vld [vmem:[#allocation2] sm:$0xff] }
  0xd4   :  { %v105_v16 = vadd.f32 %v116_v14, %v96_v15 }
  0xd6   :  { %107 = vst.msk [vmem:[%s184_s3] sm:$0xff] %vm19_vm0, %v105_v16 }
  0xd7   :  { %v97_v17 = vld [vmem:[#allocation2 + $0x8] sm:$0xff] }
  0xd8   :  { %v106_v18 = vadd.f32 %v116_v14, %v97_v17 }
  0xda   :  { %108 = vst.msk [vmem:[%s184_s3 + $0x8] sm:$0xff] %vm19_vm0, %v106_v18 }

// kernel: fwd.14
= control target key start
LH: loop header
LB: loop body
LE: loop exit
PB: predicated region body
PF: predicated region fallthrough
CT: control target
= control target key end

     0   :  { %s854_s9 = smov 0   ;;  %s954_s0 = inlined_call_operand.vmem [shape: f32[16,96], index: 0, kind: input, shape index: {}]   ;;  %s955_s1 = inlined_call_operand.vmem [shape: f32[2,1,8], index: 1, kind: input, shape index: {}]   ;;  %s956_s2 = inlined_call_operand.vmem [shape: f32[16,32], index: 2, kind: output, shape index: {}]  }
   0x1 LB: > { %s693_s10 = sadd.s32 4294967295, %s821_s9   ;;  %p697_p0 = scmp.ge.s32.totalorder %s821_s9, 1  ;;  %s821_s9 = sphi %s854_s9, %s12_s9  }
   0x2   : > { %p119_p1 = scmp.lt.s32.totalorder %s821_s9, 3 }
   0x4   : > { %p120_p2 = pnand %p697_p0, %p119_p1 }
   0x5   : > { %p142_p3 = scmp.lt.s32.totalorder (!%p120_p2), %s693_s10, 1  ;;  %s825_s15 = smov (!%p120_p2), 96  }
   0x6   : > { %123 = sbr.rel (%p120_p2) target bundleno = 1541 (0x605), region = 28  ;;  %s826_s16 = smov (!%p120_p2), 64  }
   0x7   : > { %s827_s17 = smov (!%p120_p2), 88   ;;  %s828_s21 = smov (!%p120_p2), 72  }
   0x8   : > { %s829_s22 = smov (!%p120_p2), 120   ;;  %s830_s23 = smov (!%p120_p2), 80  }
   0x9   : > { %s831_s24 = smov (!%p120_p2), 112   ;;  %s832_s25 = smov (!%p120_p2), 104  }
   0xa   : > { %s833_s26 = smov (!%p120_p2), 56   ;;  %s834_s27 = smov (!%p120_p2), 48  }
   0xb   : > { %v823_v0 = vmov 0.0   ;;  %vm824_vm0 = vmmov 0   ;;  %s958_s10 = smov (!%p142_p3, %s693_s10), 1  ;;  %vm160_vm1 = vcmask 64512   ;;  %vm232_vm2 = vcmask 1043456   ;;  %s835_s28 = smov 40  }
   0xc   : > { %727 = vmatprep.subr.bf16.mxu0 %v823_v0  ;;  %729 = vmatprep.mubr.msk.bf16.mxu0 %vm824_vm0, %v823_v0  ;;  %s698_s11 = sshll.u32 %s958_s10, 3  ;;  %s148_s20 = scalar_lea.vmem %s955_s1, %s958_s10  ;;  %vm625_vm3 = vcmask 130048   ;;  %vm627_vm4 = vcmask 195584   ;;  %vm629_vm5 = vcmask 261120  }
   0xd   : > { %733 = vmatprep.subr.bf16.mxu1 %v823_v0  ;;  %735 = vmatprep.mubr.msk.bf16.mxu1 %vm824_vm0, %v823_v0  ;;  %s145_s14 = scalar_lea.vmem %s954_s0, %s698_s11  ;;  %v891_v6 = vld [vmem:[%s148_s20] ss:$0 sm:$0xff]  ;;  %s836_s29 = smov 8  }
   0xe   : > { %v154_v1 = vld [vmem:[%s145_s14] sm:$0xff]  ;;  %s837_s30 = smov 16   ;;  %s838_s3 = smov 24  }
   0xf   : > { %v876_v2 = vpack.c.bf16 %v154_v1, %v154_v1  ;;  %s152_s6 = scalar_lea.vmem %s956_s2, %s698_s11 }
  0x11   : > { %158 = vrot.lane.b32.xlu0 %v876_v2, %s825_s15  ;;  %227 = vrot.lane.b32.xlu1 %v876_v2, %s826_s16 }
  0x15   : > { %278 = vrot.lane.b32.xlu1 %v876_v2, %s827_s17 }
  0x83   : > { %v159_v3 = vpop.permute.xlu0 %158  ;;  %v228_v13 = vpop.permute.xlu1 %227 }
  0x84   : > { %v165_v4 = vsel %vm160_vm1, %v159_v3, 0  ;;  %v234_v14 = vsel %vm232_vm2, %v228_v13, 0 }
  0x85   : > { %728 = vmatpush3.bf16.xpose.msra.mxu0 %v165_v4  ;;  %734 = vmatpush3.bf16.msra.mxu1 %v234_v14 }
  0x86   : > { %745 = vmatprep.subr.bf16.mxu0 %v823_v0  ;;  %739 = vmatprep.subr.bf16.mxu1 %v823_v0 }
  0x87   : > { %v279_v20 = vpop.permute.xlu1 %278 }
  0x88   : > { %v284_v26 = vsel %vm160_vm1, %v279_v20, 0 }
  0x8c   : > { %730 = vmatmul.mubr.msk.bf16.vlgmr.msra.gmra.mxu0 %vm160_vm1, %v876_v2 }
  0x8d   : > { %747 = vmatprep.mubr.msk.bf16.mxu0 %vm824_vm0, %v823_v0 }
 0x14c   : > { %v201_v5 = vpop.f32.mrf.mxu0 }
 0x14d   : > { %v207_v7 = vmul.f32 0.35355338, %v201_v5 }
 0x14e   : > { %v731_v8 = vpop.f32.mrf.mxu0 }
 0x14f   : > { %v214_v9 = vadd.f32 %v891_v6, %v207_v7 }
 0x150   : > { %v204_v10 = vpop.f32.mrf.mxu0 }
 0x151   : > { %v215_v11 = vsel %vm160_vm1, %v214_v9, -inf }
 0x152   : > { %216 = vmax.xlane.f32.xlu0 %v215_v11  ;;  %v732_v12 = vpop.f32.mrf.mxu0 }
 0x168   : > { %502 = vrot.lane.b32.xlu0 %v876_v2, %s828_s21 }
 0x1db   : > { %v217_v15 = vpop.xlane.xlu0 %216 }
 0x1dc   : > { %v218_v16 = vsub.f32 %v214_v9, %v217_v15 }
 0x1de   : > { %v219_v17 = vmul.f32 1.442695, %v218_v16 }
 0x1df   : > { %v503_v29 = vpop.permute.xlu0 %502 }
 0x1e0   : > { %799 = vpow2.f32 %v219_v17  ;;  %v508_v31 = vsel %vm160_vm1, %v503_v29, 0 }
 0x1ed   : > { %v800_v18 = vpop.eup %799 }
 0x1ee   : > { %v221_v19 = vsel %vm160_vm1, %v800_v18, 0.0 }
 0x1ef   : > { %222 = vadd.xlane.f32.xlu1 %v221_v19 }
 0x200   : > { %276 = vrot.lane.b32.xlu1 %v876_v2, %s829_s22 }
 0x204   : > { %390 = vrot.lane.b32.xlu1 %v876_v2, %s830_s23 }
 0x208   : > { %388 = vrot.lane.b32.xlu1 %v876_v2, %s831_s24 }
 0x20c   : > { %500 = vrot.lane.b32.xlu1 %v876_v2, %s832_s25 }
 0x278   : > { %v223_v21 = vpop.xlane.xlu1 %222 }
 0x279   : > { %801 = vrcp.f32 %v223_v21 }
 0x27c   : > { %v277_v24 = vpop.permute.xlu1 %276 }
 0x280   : > { %v391_v27 = vpop.permute.xlu1 %390 }
 0x281   : > { %v396_v28 = vsel %vm160_vm1, %v391_v27, 0 }
 0x284   : > { %v389_v30 = vpop.permute.xlu1 %388 }
 0x286   : > { %v802_v22 = vpop.eup %801 }
 0x287   : > { %v225_v23 = vmul.f32 %v802_v22, %v800_v18 }
 0x288   : > { %v501_v32 = vpop.permute.xlu1 %500 }
 0x289   : > { %v226_v25 = vpack.c.bf16 %v225_v23, %v225_v23 }
 0x28b   : > { %736 = vmatmul.mubr.msk.bf16.vlgmr.msra.gmra.mxu1 %vm160_vm1, %v226_v25 }
 0x28c   : > { %740 = vmatpush3.bf16.xpose.msra.mxu1 %v284_v26  ;;  %741 = vmatprep.mubr.msk.bf16.mxu1 %vm824_vm0, %v823_v0 }
 0x28d   : > { %751 = vmatprep.subr.bf16.mxu1 %v823_v0 }
 0x293   : > { %742 = vmatmul.mubr.msk.bf16.vlgmr.msra.gmra.mxu1 %vm160_vm1, %v277_v24 }
 0x294   : > { %752 = vmatpush3.bf16.xpose.msra.mxu1 %v396_v28  ;;  %753 = vmatprep.mubr.msk.bf16.mxu1 %vm824_vm0, %v823_v0 }
 0x295   : > { %763 = vmatprep.subr.bf16.mxu1 %v823_v0 }
 0x29b   : > { %754 = vmatmul.mubr.msk.bf16.vlgmr.msra.gmra.mxu1 %vm160_vm1, %v389_v30 }
 0x29c   : > { %764 = vmatpush3.bf16.xpose.msra.mxu1 %v508_v31  ;;  %765 = vmatprep.mubr.msk.bf16.mxu1 %vm824_vm0, %v823_v0 }
 0x2a3   : > { %766 = vmatmul.mubr.msk.bf16.vlgmr.msra.gmra.mxu1 %vm160_vm1, %v501_v32 }
 0x34b   : > { %v918_v33 = vpop.f32.mrf.mxu1 }
 0x34d   : > { %v737_v34 = vpop.f32.mrf.mxu1 }
 0x34f   : > { %v273_v35 = vpop.f32.mrf.mxu1 }
 0x351   : > { %v738_v36 = vpop.f32.mrf.mxu1 }
 0x353   : > { %v320_v37 = vpop.f32.mrf.mxu1 }
 0x354   : > { %v326_v38 = vmul.f32 0.35355338, %v320_v37 }
 0x355   : > { %v743_v39 = vpop.f32.mrf.mxu1 }
 0x356   : > { %v327_v40 = vadd.f32 %v891_v6, %v326_v38 }
 0x357   : > { %v323_v41 = vpop.f32.mrf.mxu1 }
 0x358   : > { %v328_v42 = vsel %vm160_vm1, %v327_v40, -inf }
 0x359   : > { %329 = vmax.xlane.f32.xlu1 %v328_v42  ;;  %v744_v43 = vpop.f32.mrf.mxu1 }
 0x35b   : > { %v432_v44 = vpop.f32.mrf.mxu1 }
 0x35c   : > { %v438_v45 = vmul.f32 0.35355338, %v432_v44 }
 0x35d   : > { %v755_v46 = vpop.f32.mrf.mxu1 }
 0x35e   : > { %v439_v47 = vadd.f32 %v891_v6, %v438_v45 }
 0x35f   : > { %v435_v48 = vpop.f32.mrf.mxu1 }
 0x360   : > { %v440_v49 = vsel %vm160_vm1, %v439_v47, -inf }
 0x361   : > { %441 = vmax.xlane.f32.xlu0 %v440_v49  ;;  %v756_v50 = vpop.f32.mrf.mxu1 }
 0x363   : > { %v544_v51 = vpop.f32.mrf.mxu1 }
 0x364   : > { %v550_v52 = vmul.f32 0.35355338, %v544_v51 }
 0x365   : > { %v767_v53 = vpop.f32.mrf.mxu1 }
 0x366   : > { %v551_v54 = vadd.f32 %v891_v6, %v550_v52 }
 0x367   : > { %v547_v55 = vpop.f32.mrf.mxu1 }
 0x368   : > { %v552_v56 = vsel %vm160_vm1, %v551_v54, -inf }
 0x369   : > { %553 = vmax.xlane.f32.xlu1 %v552_v56  ;;  %v768_v57 = vpop.f32.mrf.mxu1 }
 0x3e2   : > { %v330_v58 = vpop.xlane.xlu1 %329 }
 0x3e3   : > { %v331_v59 = vsub.f32 %v327_v40, %v330_v58 }
 0x3e5   : > { %v332_v60 = vmul.f32 1.442695, %v331_v59 }
 0x3e7   : > { %803 = vpow2.f32 %v332_v60 }
 0x3ea   : > { %v442_v6 = vpop.xlane.xlu0 %441 }
 0x3eb   : > { %v443_v7 = vsub.f32 %v439_v47, %v442_v6 }
 0x3ed   : > { %v444_v8 = vmul.f32 1.442695, %v443_v7 }
 0x3f2   : > { %v554_v61 = vpop.xlane.xlu1 %553 }
 0x3f3   : > { %v555_v62 = vsub.f32 %v551_v54, %v554_v61 }
 0x3f4   : > { %v804_v63 = vpop.eup %803 }
 0x3f5   : > { %v556_v1 = vmul.f32 1.442695, %v555_v62  ;;  %v334_v3 = vsel %vm160_vm1, %v804_v63, 0.0 }
 0x3f6   : > { %335 = vadd.xlane.f32.xlu1 %v334_v3 }
 0x3f7   : > { %805 = vpow2.f32 %v556_v1 }
 0x3f8   : > { %807 = vpow2.f32 %v444_v8 }
 0x404   : > { %v806_v4 = vpop.eup %805 }
 0x405   : > { %v558_v5 = vsel %vm160_vm1, %v806_v4, 0.0  ;;  %v808_v9 = vpop.eup %807 }
 0x406   : > { %559 = vadd.xlane.f32.xlu0 %v558_v5  ;;  %v446_v10 = vsel %vm160_vm1, %v808_v9, 0.0 }
 0x407   : > { %340 = vrot.lane.b32.xlu1 %v876_v2, %s833_s26 }
 0x41c   : > { %452 = vrot.lane.b32.xlu0 %v876_v2, %s834_s27 }
 0x42b   : > { %447 = vadd.xlane.f32.xlu1 %v446_v10 }
 0x43c   : > { %564 = vrot.lane.b32.xlu1 %v876_v2, %s835_s28 }
 0x47f   : > { %v336_v11 = vpop.xlane.xlu1 %335 }
 0x480   : > { %809 = vrcp.f32 %v336_v11 }
 0x483   : > { %v341_v12 = vpop.permute.xlu1 %340 }
 0x484   : > { %v346_v13 = vsel %vm232_vm2, %v341_v12, 0 }
 0x485   : > { %746 = vmatpush3.bf16.msra.mxu0 %v346_v13 }
 0x486   : > { %757 = vmatprep.subr.bf16.mxu0 %v823_v0 }
 0x48d   : > { %v810_v14 = vpop.eup %809 }
 0x48e   : > { %v338_v15 = vmul.f32 %v810_v14, %v804_v63 }
 0x48f   : > { %v560_v16 = vpop.xlane.xlu0 %559 }
 0x490   : > { %v339_v17 = vpack.c.bf16 %v338_v15, %v338_v15 }
 0x492   : > { %748 = vmatmul.mubr.msk.bf16.vlgmr.msra.gmra.mxu0 %vm160_vm1, %v339_v17 }
 0x493   : > { %v453_v18 = vpop.permute.xlu0 %452  ;;  %759 = vmatprep.mubr.msk.bf16.mxu0 %vm824_vm0, %v823_v0 }
 0x494   : > { %v458_v2 = vsel %vm232_vm2, %v453_v18, 0 }
 0x495   : > { %758 = vmatpush3.bf16.msra.mxu0 %v458_v2 }
 0x496   : > { %769 = vmatprep.subr.bf16.mxu0 %v823_v0 }
 0x4b4   : > { %v448_v19 = vpop.xlane.xlu1 %447 }
 0x4b5   : > { %811 = vrcp.f32 %v448_v19 }
 0x4b6   : > { %813 = vrcp.f32 %v560_v16 }
 0x4b8   : > { %v565_v21 = vpop.permute.xlu1 %564 }
 0x4b9   : > { %v570_v23 = vsel %vm232_vm2, %v565_v21, 0 }
 0x4c2   : > { %v812_v20 = vpop.eup %811 }
 0x4c3   : > { %v450_v22 = vmul.f32 %v812_v20, %v808_v9  ;;  %v814_v25 = vpop.eup %813 }
 0x4c4   : > { %v562_v26 = vmul.f32 %v814_v25, %v806_v4 }
 0x4c5   : > { %v451_v24 = vpack.c.bf16 %v450_v22, %v450_v22 }
 0x4c6   : > { %v563_v27 = vpack.c.bf16 %v562_v26, %v562_v26 }
 0x4c7   : > { %760 = vmatmul.mubr.msk.bf16.vlgmr.msra.gmra.mxu0 %vm160_vm1, %v451_v24 }
 0x4c8   : > { %770 = vmatpush3.bf16.msra.mxu0 %v570_v23  ;;  %771 = vmatprep.mubr.msk.bf16.mxu0 %vm824_vm0, %v823_v0 }
 0x4cf   : > { %772 = vmatmul.mubr.msk.bf16.vlgmr.msra.gmra.mxu0 %vm160_vm1, %v563_v27 }
 0x552   : > { %v382_v28 = vpop.f32.mrf.mxu0 }
 0x553   : > { %613 = vrot.lane.b32.xlu1 %v382_v28, %s836_s29 }
 0x554   : > { %v749_v29 = vpop.f32.mrf.mxu0 }
 0x556   : > { %v385_v30 = vpop.f32.mrf.mxu0 }
 0x558   : > { %v750_v31 = vpop.f32.mrf.mxu0 }
 0x587   : > { %v494_v32 = vpop.f32.mrf.mxu0 }
 0x588   : > { %617 = vrot.lane.b32.xlu0 %v494_v32, %s837_s30 }
 0x589   : > { %v761_v34 = vpop.f32.mrf.mxu0 }
 0x58b   : > { %v497_v35 = vpop.f32.mrf.mxu0 }
 0x58d   : > { %v762_v36 = vpop.f32.mrf.mxu0 }
 0x58f   : > { %v606_v37 = vpop.f32.mrf.mxu0 }
 0x590   : > { %621 = vrot.lane.b32.xlu1 %v606_v37, %s838_s3 }
 0x591   : > { %v773_v0 = vpop.f32.mrf.mxu0 }
 0x593   : > { %v609_v38 = vpop.f32.mrf.mxu0 }
 0x595   : > { %v774_v39 = vpop.f32.mrf.mxu0 }
 0x5c5   : > { %v614_v40 = vpop.permute.xlu1 %613 }
 0x5c6   : > { %v624_v42 = vsel %vm160_vm1, %v918_v33, %v614_v40 }
 0x5fa   : > { %v618_v41 = vpop.permute.xlu0 %617 }
 0x5fb   : > { %v626_v43 = vsel %vm625_vm3, %v624_v42, %v618_v41 }
 0x602   : > { %v622_v44 = vpop.permute.xlu1 %621 }
 0x603   : > { %v628_v45 = vsel %vm627_vm4, %v626_v43, %v622_v44 }
 0x604   : > { %630 = vst.msk [vmem:[%s152_s6] sm:$0xff] %vm629_vm5, %v628_v45 }
 0x605 PF: > { %s12_s9 = sadd.s32 1, %s821_s9  }
 0x606   : > { %p9_p4 = scmp.ge.s32.totalorder %s12_s9, 4  }
 0x608   :  { %11 = sbr.rel (!%p9_p4) target bundleno = 1 (0x1), region = 61 }

// kernel: fwd.16
= control target key start
LH: loop header
LB: loop body
LE: loop exit
PB: predicated region body
PF: predicated region fallthrough
CT: control target
= control target key end

     0   :  { %vm19_vm0 = vcmask 523264   ;;  %v154_v0 = vmov 0.0   ;;  %vm155_vm1 = vmmov 0   ;;  %vm43_vm2 = vcmask 261120   ;;  %s203_s1 = inlined_call_operand.vmem [shape: bf16[32,64], index: 1, kind: input, shape index: {}]   ;;  %s204_s0 = inlined_call_operand.vmem [shape: f32[16,32], index: 0, kind: input, shape index: {}]   ;;  %s205_s2 = inlined_call_operand.vmem [shape: f32[1,64], index: 2, kind: input, shape index: {}]   ;;  %s206_s3 = inlined_call_operand.vmem [shape: f32[16,64], index: 3, kind: output, shape index: {}]  }
   0x1   :  { %138 = vmatprep.subr.bf16.mxu0 %v154_v0  ;;  %v148_v1 = vld [vmem:[%s203_s1 + $0x8] sm:$0xff]   ;;  %142 = vmatprep.mubr.msk.bf16.mxu0 %vm155_vm1, %v154_v0  ;;  %20 = vst.msk [vmem:[#allocation2] sm:$0xff] %vm19_vm0, %v154_v0  ;;  %21 = vst.msk [vmem:[#allocation2 + $0x8] sm:$0xff] %vm19_vm0, %v154_v0  ;;  %v149_v2 = vld [vmem:[%s203_s1] sm:$0xff]  }
   0x2   :  { %139 = vmatpush3.bf16.msra.mxu0 %v148_v1  ;;  %v24_v3 = vld [vmem:[%s204_s0] sm:$0xff]  ;;  %v25_v4 = vld [vmem:[%s204_s0 + $0x8] sm:$0xff] }
   0x3   :  { %140 = vmatprep.subr.bf16.mxu0 %v154_v0  ;;  %v26_v5 = vpack.c.bf16 %v25_v4, %v24_v3  ;;  %v134_v14 = vld [vmem:[%s205_s2] ss:$0 sm:$0xff] }
   0x6   :  { %141 = vmatpush3.bf16.msra.mxu0 %v149_v2 }
   0x8   :  { %v22_v6 = vld [vmem:[#allocation2] sm:$0xff]  ;;  %v23_v10 = vld [vmem:[#allocation2 + $0x8] sm:$0xff] }
   0x9   :  { %143 = vmatmul.mubr.msk.bf16.vlgmr.msra.gmra.mxu0 %vm43_vm2, %v26_v5 }
  0xc9   :  { %v81_v7 = vpop.f32.mrf.mxu0 }
  0xca   :  { %v88_v8 = vadd.f32 %v81_v7, %v22_v6 }
  0xcb   :  { %v144_v9 = vpop.f32.mrf.mxu0 }
  0xcc   :  { %91 = vst.msk [vmem:[#allocation2] sm:$0xff] %vm19_vm0, %v88_v8 }
  0xcd   :  { %v84_v11 = vpop.f32.mrf.mxu0 }
  0xce   :  { %v89_v12 = vadd.f32 %v84_v11, %v23_v10 }
  0xcf   :  { %v145_v13 = vpop.f32.mrf.mxu0 }
  0xd0   :  { %92 = vst.msk [vmem:[#allocation2 + $0x8] sm:$0xff] %vm19_vm0, %v89_v12 }
  0xd3   :  { %v96_v15 = vld [vmem:[#allocation2] sm:$0xff] }
  0xd4   :  { %v105_v16 = vadd.f32 %v134_v14, %v96_v15 }
  0xd6   :  { %v109_v17 = vmul.f32 0.044715, %v105_v16  ;;  %v107_v30 = vmul.f32 0.5, %v105_v16 }
  0xd7   :  { %v97_v18 = vld [vmem:[#allocation2 + $0x8] sm:$0xff] }
  0xd8   :  { %v111_v19 = vmul.f32 %v109_v17, %v105_v16  ;;  %v106_v20 = vadd.f32 %v134_v14, %v97_v18 }
  0xda   :  { %v113_v21 = vmul.f32 %v111_v19, %v105_v16  ;;  %v110_v22 = vmul.f32 0.044715, %v106_v20  ;;  %v108_v34 = vmul.f32 0.5, %v106_v20 }
  0xdc   :  { %v115_v23 = vadd.f32 %v113_v21, %v105_v16  ;;  %v112_v24 = vmul.f32 %v110_v22, %v106_v20 }
  0xde   :  { %v117_v25 = vmul.f32 0.7978846, %v115_v23  ;;  %v114_v26 = vmul.f32 %v112_v24, %v106_v20 }
  0xe0   :  { %150 = vtanh.f32 %v117_v25  ;;  %v116_v27 = vadd.f32 %v114_v26, %v106_v20 }
  0xe2   :  { %v118_v28 = vmul.f32 0.7978846, %v116_v27 }
  0xe4   :  { %152 = vtanh.f32 %v118_v28 }
  0xed   :  { %v151_v29 = vpop.eup %150 }
  0xee   :  { %v121_v31 = vadd.f32 1.0, %v151_v29 }
  0xf0   :  { %v123_v32 = vmul.f32 %v121_v31, %v107_v30 }
  0xf1   :  { %v153_v33 = vpop.eup %152 }
  0xf2   :  { %125 = vst.msk [vmem:[%s206_s3] sm:$0xff] %vm19_vm0, %v123_v32  ;;  %v122_v35 = vadd.f32 1.0, %v153_v33 }
  0xf4   :  { %v124_v36 = vmul.f32 %v122_v35, %v108_v34 }
  0xf6   :  { %126 = vst.msk [vmem:[%s206_s3 + $0x8] sm:$0xff] %vm19_vm0, %v124_v36 }

// kernel: fwd.17
= control target key start
LH: loop header
LB: loop body
LE: loop exit
PB: predicated region body
PF: predicated region fallthrough
CT: control target
= control target key end

     0   :  { %vm28_vm0 = vcmask 261120   ;;  %v222_v0 = vmov 0.0   ;;  %vm223_vm1 = vmmov 0   ;;  %vm68_vm2 = vcmask 523264   ;;  %s308_s1 = inlined_call_operand.vmem [shape: bf16[64,32], index: 1, kind: input, shape index: {}]   ;;  %s309_s0 = inlined_call_operand.vmem [shape: f32[16,64], index: 0, kind: input, shape index: {}]   ;;  %s310_s2 = inlined_call_operand.vmem [shape: f32[1,32], index: 2, kind: input, shape index: {}]   ;;  %s311_s3 = inlined_call_operand.vmem [shape: f32[16,32], index: 3, kind: input, shape index: {}]   ;;  %s312_s4 = inlined_call_operand.vmem [shape: f32[1,32], index: 4, kind: input, shape index: {}]   ;;  %s313_s5 = inlined_call_operand.vmem [shape: f32[1,32], index: 5, kind: input, shape index: {}]   ;;  %s314_s6 = inlined_call_operand.vmem [shape: f32[16,32], index: 6, kind: output, shape index: {}]  }
   0x1   :  { %200 = vmatprep.subr.bf16.mxu0 %v222_v0  ;;  %v214_v1 = vld [vmem:[%s308_s1 + $0x18] sm:$0xff]   ;;  %208 = vmatprep.mubr.msk.bf16.mxu0 %vm223_vm1, %v222_v0  ;;  %29 = vst.msk [vmem:[#allocation2] sm:$0xff] %vm28_vm0, %v222_v0  ;;  %30 = vst.msk [vmem:[#allocation2 + $0x8] sm:$0xff] %vm28_vm0, %v222_v0  ;;  %v215_v2 = vld [vmem:[%s308_s1 + $0x10] sm:$0xff]  }
   0x2   :  { %201 = vmatpush3.bf16.msra.mxu0 %v214_v1  ;;  %v216_v3 = vld [vmem:[%s308_s1 + $0x8] sm:$0xff]   ;;  %v217_v4 = vld [vmem:[%s308_s1] sm:$0xff]  }
   0x3   :  { %202 = vmatprep.subr.bf16.mxu0 %v222_v0  ;;  %v33_v5 = vld [vmem:[%s309_s0] sm:$0xff]  ;;  %v34_v6 = vld [vmem:[%s309_s0 + $0x8] sm:$0xff] }
   0x4   :  { %v35_v7 = vpack.c.bf16 %v34_v6, %v33_v5  ;;  %v192_v16 = vld [vmem:[%s310_s2] ss:$0 sm:$0xff]  ;;  %v133_v22 = vld [vmem:[%s311_s3 + $0x8] sm:$0xff] }
   0x5   :  { %v132_v18 = vld [vmem:[%s311_s3] sm:$0xff] }
   0x6   :  { %203 = vmatpush3.bf16.msra.mxu0 %v215_v2  ;;  %v193_v44 = vld [vmem:[%s312_s4] ss:$0 sm:$0xff] }
   0x7   :  { %204 = vmatprep.subr.bf16.mxu0 %v222_v0  ;;  %v194_v46 = vld [vmem:[%s313_s5] ss:$0 sm:$0xff] }
   0x8   :  { %v31_v8 = vld [vmem:[#allocation2] sm:$0xff]  ;;  %v32_v12 = vld [vmem:[#allocation2 + $0x8] sm:$0xff] }
   0xa   :  { %205 = vmatpush3.bf16.msra.mxu0 %v216_v3 }
   0xb   :  { %206 = vmatprep.subr.bf16.mxu0 %v222_v0 }
   0xe   :  { %207 = vmatpush3.bf16.msra.mxu0 %v217_v4 }
  0x11   :  { %209 = vmatmul.mubr.msk.bf16.vlgmr.msra.gmra.mxu0 %vm68_vm2, %v35_v7 }
  0xd1   :  { %v106_v9 = vpop.f32.mrf.mxu0 }
  0xd2   :  { %v113_v10 = vadd.f32 %v106_v9, %v31_v8 }
  0xd3   :  { %v210_v11 = vpop.f32.mrf.mxu0 }
  0xd4   :  { %116 = vst.msk [vmem:[#allocation2] sm:$0xff] %vm28_vm0, %v113_v10 }
  0xd5   :  { %v109_v13 = vpop.f32.mrf.mxu0 }
  0xd6   :  { %v114_v14 = vadd.f32 %v109_v13, %v32_v12 }
  0xd7   :  { %v211_v15 = vpop.f32.mrf.mxu0 }
  0xd8   :  { %117 = vst.msk [vmem:[#allocation2 + $0x8] sm:$0xff] %vm28_vm0, %v114_v14 }
  0xdb   :  { %v121_v17 = vld [vmem:[#allocation2] sm:$0xff] }
  0xdc   :  { %v130_v19 = vadd.f32 %v192_v16, %v121_v17 }
  0xde   :  { %v134_v20 = vadd.f32 %v132_v18, %v130_v19 }
  0xdf   :  { %v122_v21 = vld [vmem:[#allocation2 + $0x8] sm:$0xff] }
  0xe0   :  { %v136_v23 = vsel %vm28_vm0, %v134_v20, 0.0  ;;  %v131_v24 = vadd.f32 %v192_v16, %v122_v21 }
  0xe1   :  { %137 = vadd.xlane.f32.xlu0 %v136_v23 }
  0xe2   :  { %v135_v25 = vadd.f32 %v133_v22, %v131_v24 }
  0xe4   :  { %v139_v26 = vsel %vm28_vm0, %v135_v25, 0.0 }
  0xe5   :  { %140 = vadd.xlane.f32.xlu0 %v139_v26 }
 0x16a   :  { %v138_v27 = vpop.xlane.xlu0 %137 }
 0x16b   :  { %v143_v28 = vmul.f32 0.03125, %v138_v27 }
 0x16d   :  { %v145_v29 = vsub.f32 %v134_v20, %v143_v28 }
 0x16e   :  { %v141_v30 = vpop.xlane.xlu0 %140 }
 0x16f   :  { %v144_v31 = vmul.f32 0.03125, %v141_v30  ;;  %v147_v32 = vmul.f32 %v145_v29, %v145_v29 }
 0x171   :  { %v146_v33 = vsub.f32 %v135_v25, %v144_v31  ;;  %v149_v34 = vsel %vm28_vm0, %v147_v32, 0.0 }
 0x172   :  { %150 = vadd.xlane.f32.xlu1 %v149_v34 }
 0x173   :  { %v148_v35 = vmul.f32 %v146_v33, %v146_v33 }
 0x175   :  { %v152_v36 = vsel %vm28_vm0, %v148_v35, 0.0 }
 0x176   :  { %153 = vadd.xlane.f32.xlu1 %v152_v36 }
 0x1fb   :  { %v151_v37 = vpop.xlane.xlu1 %150 }
 0x1fc   :  { %v155_v38 = vmul.f32 0.03125, %v151_v37 }
 0x1fe   :  { %v157_v39 = vadd.f32 1e-12, %v155_v38 }
 0x1ff   :  { %v154_v40 = vpop.xlane.xlu1 %153 }
 0x200   :  { %218 = vrsqrt.f32 %v157_v39  ;;  %v156_v41 = vmul.f32 0.03125, %v154_v40 }
 0x202   :  { %v158_v42 = vadd.f32 1e-12, %v156_v41 }
 0x204   :  { %220 = vrsqrt.f32 %v158_v42 }
 0x20d   :  { %v219_v43 = vpop.eup %218 }
 0x20e   :  { %v161_v45 = vmul.f32 %v219_v43, %v145_v29 }
 0x210   :  { %v170_v47 = vmul.f32 %v193_v44, %v161_v45 }
 0x211   :  { %v221_v48 = vpop.eup %220 }
 0x212   :  { %v179_v49 = vadd.f32 %v194_v46, %v170_v47  ;;  %v162_v50 = vmul.f32 %v221_v48, %v146_v33 }
 0x214   :  { %181 = vst.msk [vmem:[%s314_s6] sm:$0xff] %vm28_vm0, %v179_v49  ;;  %v171_v51 = vmul.f32 %v193_v44, %v162_v50 }
 0x216   :  { %v180_v52 = vadd.f32 %v194_v46, %v171_v51 }
 0x218   :  { %182 = vst.msk [vmem:[%s314_s6 + $0x8] sm:$0xff] %vm28_vm0, %v180_v52 }

// kernel: fwd.23
= control target key start
LH: loop header
LB: loop body
LE: loop exit
PB: predicated region body
PF: predicated region fallthrough
CT: control target
= control target key end

     0   :  { %v236_v1 = vmov 0.0   ;;  %vm237_vm0 = vmmov 0   ;;  %s295_s0 = inlined_call_operand.vmem [shape: f32[2,32], index: 0, kind: input, shape index: {}]   ;;  %s296_s1 = inlined_call_operand.vmem [shape: bf16[32,32], index: 1, kind: input, shape index: {}]   ;;  %s297_s2 = inlined_call_operand.vmem [shape: f32[1,32], index: 2, kind: input, shape index: {}]   ;;  %s298_s3 = inlined_call_operand.vmem [shape: bf16[32,3], index: 3, kind: input, shape index: {}]   ;;  %s299_s4 = inlined_call_operand.vmem [shape: f32[1,3], index: 4, kind: input, shape index: {}]   ;;  %s300_s5 = inlined_call_operand.hbm [shape: f32[2,3], index: 5, kind: output, shape index: {}]  }
   0x1   :  { %v208_v0 = vld [vmem:[%s296_s1 + $0x8] sm:$0xff]   ;;  %189 = vmatprep.subr.bf16.mxu0 %v236_v1  ;;  %197 = vmatprep.subr.bf16.mxu1 %v236_v1  ;;  %v209_v2 = vld [vmem:[%s296_s1] sm:$0xff]  }
   0x2   :  { %190 = vmatpush3.bf16.msra.mxu0 %v208_v0  ;;  %193 = vmatprep.mubr.msk.bf16.mxu0 %vm237_vm0, %v236_v1  ;;  %v22_v3 = vld [vmem:[%s295_s0] sm:$0x3] }
   0x3   :  { %191 = vmatprep.subr.bf16.mxu0 %v236_v1  ;;  %201 = vmatprep.mubr.msk.bf16.mxu1 %vm237_vm0, %v236_v1 }
   0x4   :  { %10 = vsyncpa [#allocation3], 0  ;;  %v23_v4 = vpack.c.bf16 %v22_v3, %v22_v3  ;;  %vm47_vm1 = vcmask 261120   ;;  %v210_v5 = vld [vmem:[%s298_s3 + $0x8] sm:$0xff]   ;;  %v211_v6 = vld [vmem:[%s298_s3] sm:$0xff]   ;;  %s238_s3 = smov [#allocation2]  }
   0x5   :  { %198 = vmatpush3.bf16.msra.mxu1 %v210_v5  ;;  %v175_v7 = vld [vmem:[%s297_s2] ss:$0 sm:$0xff]  ;;  %s167_s30 = sshll.u32 %s238_s3, 4  ;;  %vm159_vm2 = vcmask 17408   ;;  %s168_s30 = int_to_ptr.vmem [resolvable:$true] %s167_s30 }
   0x6   :  { %192 = vmatpush3.bf16.msra.mxu0 %v209_v2  ;;  %199 = vmatprep.subr.bf16.mxu1 %v236_v1  ;;  %v179_v15 = vld [vmem:[%s299_s4] ss:$0 sm:$0xff]  ;;  %s214_s2 = scalar_lea.vmem %s168_s30, 32  ;;  %p219_p1 = scmp.lt.s32.totalorder %s168_s30, %s168_s30 }
   0x7   :  { %p215_p0 = scmp.ne.s32.totalorder %s168_s30, %s214_s2  ;;  %p220_p2 = scmp.lt.s32.totalorder %s214_s2, %s214_s2 }
   0x9   :  { %194 = vmatmul.mubr.msk.bf16.vlgmr.msra.gmra.mxu0 %vm47_vm1, %v23_v4  ;;  %200 = vmatpush3.bf16.msra.mxu1 %v211_v6  ;;  %p221_p3 = por %p220_p2, %p219_p1 }
   0xb   :  { %p222_p4 = pnand %p221_p3, %p215_p0 }
  0xc9   :  { %v85_v8 = vpop.f32.mrf.mxu0 }
  0xca   :  { %v86_v9 = vadd.f32 %v175_v7, %v85_v8 }
  0xcb   :  { %v195_v10 = vpop.f32.mrf.mxu0 }
  0xcc   :  { %212 = vtanh.f32 %v86_v9 }
  0xcd   :  { %v88_v11 = vpop.f32.mrf.mxu0 }
  0xcf   :  { %v196_v12 = vpop.f32.mrf.mxu0 }
  0xd9   :  { %v213_v13 = vpop.eup %212 }
  0xda   :  { %v92_v14 = vpack.c.bf16 %v213_v13, %v213_v13 }
  0xdc   :  { %202 = vmatmul.mubr.msk.bf16.vlgmr.msra.gmra.mxu1 %vm47_vm1, %v92_v14 }
 0x19c   :  { %v153_v16 = vpop.f32.mrf.mxu1 }
 0x19d   :  { %v154_v17 = vadd.f32 %v179_v15, %v153_v16 }
 0x19e   :  { %v203_v18 = vpop.f32.mrf.mxu1 }
 0x19f   :  { %160 = vst.msk [vmem:[#allocation2] sm:$0x3] %vm159_vm2, %v154_v17 }
 0x1a0   :  { %v156_v19 = vpop.f32.mrf.mxu1 }
 0x1a1   :  { %225 = shalt.err (!%p222_p4)
}
 0x1a2   :  { %170 = dma.vmem_to_hbm [thread:$0]  %s168_s30, 32, %s300_s5, [#allocation3]   ;;  %v204_v20 = vpop.f32.mrf.mxu1 }
 0x1a3   :  { %234 = dma.done.wait [#allocation3], 32  }
 0x1a4   :  { %235 = vsyncadd [#allocation3], 4294967264 }
 0x1a5   :  { %174 = vsyncpa [#allocation3], 1 }

</bundles_post_ra>
